<compile_context>
chip_gen: v5e
topology: v5e:2x2
jax: 0.10.0
libtpu: 0.0.40
codegen_flags: <defaults>
</compile_context>

<pallas_src>
import math
import functools

import jax
import jax.numpy as jnp
import numpy as np
from jax.experimental import pallas as pl
from jax.experimental.pallas import tpu as pltpu

# ----------------------------- model config ---------------------------------
MAX_LEN = 64
STRIDE = 2
IN_PARAM = 14
OUT_PARAM = 5
OUT_PAD = 128            # lane-dense padded generator width
D_MODEL = 128
NHEAD = 8
HEAD_DIM = D_MODEL // NHEAD
NUM_LAYERS = 8
DIM_FF = 256
LN_EPS = 1e-5

# small test shapes
BATCH = 2
SEQ = 8


# --------------------------- positional encoding ----------------------------
def make_positional_encoding(d_model, max_len, stride):
    half = d_model // 2
    k = half // 2
    position = jnp.linspace(0.0, (max_len - 1) * stride, max_len)
    div_term = jnp.exp(
        jnp.arange(0, half, 2, dtype=jnp.float32) * (-2.0 * math.log(10000.0) / d_model)
    )
    a = position[:, None, None] * div_term[None, None, :]  # (max_len, 1, k)
    b = position[None, :, None] * div_term[None, None, :]  # (1, max_len, k)
    a_sin = jnp.broadcast_to(jnp.sin(a), (max_len, max_len, k))
    a_cos = jnp.broadcast_to(jnp.cos(a), (max_len, max_len, k))
    b_sin = jnp.broadcast_to(jnp.sin(b), (max_len, max_len, k))
    b_cos = jnp.broadcast_to(jnp.cos(b), (max_len, max_len, k))
    pe = jnp.zeros((max_len, max_len, d_model), dtype=jnp.float32)
    pe = pe.at[:, :, 0:half:2].set(a_sin)
    pe = pe.at[:, :, 1:half:2].set(a_cos)
    pe = pe.at[:, :, half:d_model:2].set(b_sin)
    pe = pe.at[:, :, half + 1:d_model:2].set(b_cos)
    return pe.reshape(max_len * max_len, d_model)  # flattened, like .flatten(0,1)


# ------------------------------ parameters -----------------------------------
def init_params(key):
    def nrm(k, shape, scale=0.02):
        return (scale * jax.random.normal(k, shape)).astype(jnp.float32)

    keys = jax.random.split(key, 16)
    p = {}
    p["w_in_t"] = nrm(keys[0], (IN_PARAM, D_MODEL))
    p["b_in"] = nrm(keys[1], (1, D_MODEL))

    p["wqkv_t"] = nrm(keys[2], (NUM_LAYERS, D_MODEL, 3 * D_MODEL))
    p["bqkv"] = nrm(keys[3], (NUM_LAYERS, 1, 3 * D_MODEL))
    p["wo_t"] = nrm(keys[4], (NUM_LAYERS, D_MODEL, D_MODEL))
    p["bo"] = nrm(keys[5], (NUM_LAYERS, 1, D_MODEL))
    p["ln1_w"] = jnp.ones((NUM_LAYERS, 1, D_MODEL), jnp.float32)
    p["ln1_b"] = jnp.zeros((NUM_LAYERS, 1, D_MODEL), jnp.float32)
    p["w1_t"] = nrm(keys[6], (NUM_LAYERS, D_MODEL, DIM_FF))
    p["b1"] = nrm(keys[7], (NUM_LAYERS, 1, DIM_FF))
    p["w2_t"] = nrm(keys[8], (NUM_LAYERS, DIM_FF, D_MODEL))
    p["b2"] = nrm(keys[9], (NUM_LAYERS, 1, D_MODEL))
    p["ln2_w"] = jnp.ones((NUM_LAYERS, 1, D_MODEL), jnp.float32)
    p["ln2_b"] = jnp.zeros((NUM_LAYERS, 1, D_MODEL), jnp.float32)

    p["lnf_w"] = jnp.ones((1, D_MODEL), jnp.float32)
    p["lnf_b"] = jnp.zeros((1, D_MODEL), jnp.float32)
    p["wg_t"] = nrm(keys[10], (D_MODEL, OUT_PARAM))
    p["bg"] = nrm(keys[11], (1, OUT_PARAM))
    return p


# ------------------------------- Pallas kernel -------------------------------
def _layer_norm(x, w, b, eps=LN_EPS):
    mu = jnp.mean(x, axis=-1, keepdims=True)
    d = x - mu
    var = jnp.mean(d * d, axis=-1, keepdims=True)
    return d * jax.lax.rsqrt(var + eps) * w + b


def transformer_kernel(
    src_ref, inbias_ref, vmask_ref, segmat_ref,
    w_in_ref,
    wqkv_ref, bqkv_ref, wo_ref, bo_ref, ln1w_ref, ln1b_ref,
    w1_ref, b1_ref, w2_ref, b2_ref, ln2w_ref, ln2b_ref,
    lnfw_ref, lnfb_ref, wg_ref, bg_ref,
    out_ref,
    x_ref,                    # VMEM scratch: running activation (m_blk, D)
    *, b_tile, seq,
):
    l = pl.program_id(1)

    # ---- first layer step: input projection + (bias + positional encoding) ----
    @pl.when(l == 0)
    def _():
        x0 = jnp.dot(src_ref[...], w_in_ref[...], preferred_element_type=jnp.float32)
        inb = inbias_ref[...]                                     # (S, D)
        x_ref[...] = x0 + jnp.concatenate([inb] * b_tile, axis=0)

    x = x_ref[...]                                                # (M, D) f32
    vmask = vmask_ref[...]                                        # (NHEAD*S, D) 0/1
    segmat = segmat_ref[...]                                      # (NHEAD*S, NHEAD*S) 0/1

    # NOTE: 1/sqrt(HEAD_DIM) is pre-folded into the Q third of wqkv / bqkv.
    # Dropout (p=0.1) is identity in eval mode.

    # ---- self attention (post-norm layer, norm_first=False) ----
    qkv = jnp.dot(x.astype(jnp.bfloat16), wqkv_ref[...],
                  preferred_element_type=jnp.float32) + bqkv_ref[...]   # (M, 3D) f32
    q = qkv[:, 0:D_MODEL]
    k = qkv[:, D_MODEL:2 * D_MODEL]
    v = qkv[:, 2 * D_MODEL:3 * D_MODEL]

    outs = []
    for b in range(b_tile):                     # static, tiny (<= 2)
        qb = q[b * seq:(b + 1) * seq, :]        # (S, D) sublane slice
        kb = k[b * seq:(b + 1) * seq, :]
        vb = v[b * seq:(b + 1) * seq, :]
        # block-diagonal (per-head) K and V: sublane-tile x NHEAD then mask.
        kbd = jnp.concatenate([kb] * NHEAD, axis=0) * vmask      # (NHEAD*S, D)
        vbd = jnp.concatenate([vb] * NHEAD, axis=0) * vmask      # (NHEAD*S, D)
        # all heads' scores in one K=128 contraction: (S, NHEAD*S)
        s = jnp.einsum('qd,cd->qc', qb, kbd, preferred_element_type=jnp.float32)
        # A per-row max is shared by every head segment, so the segmented
        # softmax below stays exact; underflow would need a head ~80+ below
        # the row max, unreachable for layer-normed activations here.
        s = s - jnp.max(s, axis=-1, keepdims=True)
        p = jnp.exp(s)
        denom = jnp.dot(p, segmat, preferred_element_type=jnp.float32)  # per-head sums
        p = p * pl.reciprocal(denom, approx=True)
        # P @ block-diag(V): output is already merged-head (S, D)
        outs.append(jnp.dot(p, vbd, preferred_element_type=jnp.float32))
    attn = jnp.concatenate(outs, axis=0)                          # (M, D) f32

    attn = jnp.dot(attn.astype(jnp.bfloat16), wo_ref[...],
                   preferred_element_type=jnp.float32) + bo_ref[...]
    x = _layer_norm(x + attn, ln1w_ref[...], ln1b_ref[...])

    # ---- feed forward ----
    h1 = jnp.dot(x.astype(jnp.bfloat16), w1_ref[...],
                 preferred_element_type=jnp.float32) + b1_ref[...]
    h1 = jnp.maximum(h1, 0.0)                                     # relu
    h2 = jnp.dot(h1.astype(jnp.bfloat16), w2_ref[...],
                 preferred_element_type=jnp.float32) + b2_ref[...]
    x = _layer_norm(x + h2, ln2w_ref[...], ln2b_ref[...])
    x_ref[...] = x

    # ---- last layer step: final encoder norm + generator (lane-dense 128) ----
    @pl.when(l == pl.num_programs(1) - 1)
    def _():
        xf = _layer_norm(x, lnfw_ref[...], lnfb_ref[...])
        out_ref[...] = jnp.dot(xf, wg_ref[...],
                               preferred_element_type=jnp.float32) + bg_ref[...]


# ------------------------------ wrapper ---------------------------------------
def _num_tensorcores():
    try:
        kind = jax.devices()[0].device_kind.lower()
    except Exception:
        return 1
    if "v7" in kind or "tpu7" in kind or "v4" in kind or "v5p" in kind:
        return 2       # 2 TensorCores (or megacore) -> want >=2 parallel batch steps
    return 1


def _pick_batch_tile(B, S, num_cores):
    # Keep M = b_tile*S <= 256 (MXU fill), B % b_tile == 0, and give the batch
    # grid axis at least `num_cores` steps so "parallel" can use both cores.
    bt = B
    while bt > 1 and (bt * S > 256 or B % bt != 0 or (B // bt) < num_cores):
        bt -= 1
    return max(bt, 1)


def _prep_params(p):
    scale = 1.0 / math.sqrt(HEAD_DIM)
    wqkv = p["wqkv_t"].at[:, :, :D_MODEL].multiply(scale)      # fold Q scale
    bqkv = p["bqkv"].at[:, :, :D_MODEL].multiply(scale)
    # lane-dense generator: zero-pad OUT_PARAM -> OUT_PAD columns
    wg = jnp.zeros((D_MODEL, OUT_PAD), jnp.float32).at[:, :OUT_PARAM].set(p["wg_t"])
    bg = jnp.zeros((1, OUT_PAD), jnp.float32).at[:, :OUT_PARAM].set(p["bg"])
    return {
        "w_in": p["w_in_t"],
        "wqkv": wqkv.astype(jnp.bfloat16), "bqkv": bqkv,
        "wo": p["wo_t"].astype(jnp.bfloat16), "bo": p["bo"],
        "ln1w": p["ln1_w"], "ln1b": p["ln1_b"],
        "w1": p["w1_t"].astype(jnp.bfloat16), "b1": p["b1"],
        "w2": p["w2_t"].astype(jnp.bfloat16), "b2": p["b2"],
        "ln2w": p["ln2_w"], "ln2b": p["ln2_b"],
        "lnfw": p["lnf_w"], "lnfb": p["lnf_b"],
        "wg": wg, "bg": bg,
    }


def transformer_refinement(src, pe_slice, params):
    B, S, _ = src.shape
    b_tile = _pick_batch_tile(B, S, _num_tensorcores())
    m_blk = b_tile * S
    grid = (B // b_tile, NUM_LAYERS)      # layer axis last ("arbitrary")

    prepped = _prep_params(params)
    inbias = pe_slice + params["b_in"]    # (S, D): broadcast over batch in-kernel

    # static 0/1 masks for the block-diagonal head attention
    col_head = np.repeat(np.arange(NHEAD), S)              # head id per score column
    dim_head = np.repeat(np.arange(NHEAD), HEAD_DIM)       # head id per model dim
    vmask = jnp.asarray((col_head[:, None] == dim_head[None, :]).astype(np.float32))
    segmat = jnp.asarray((col_head[:, None] == col_head[None, :]).astype(np.float32))

    layer_names = ["wqkv", "bqkv", "wo", "bo", "ln1w", "ln1b",
                   "w1", "b1", "w2", "b2", "ln2w", "ln2b"]
    const_names = ["lnfw", "lnfb", "wg", "bg"]

    def const_spec(a):
        nd = a.ndim
        return pl.BlockSpec(tuple(a.shape), lambda b, l, _nd=nd: (0,) * _nd)

    def layer_spec(a):
        # per-layer block: squeeze the layer dim, stream layer l each grid step
        return pl.BlockSpec((None,) + tuple(a.shape[1:]), lambda b, l: (l, 0, 0))

    in_specs = (
        [pl.BlockSpec((m_blk, IN_PARAM), lambda b, l: (b, 0)),   # src rows (batch in M)
         const_spec(inbias), const_spec(vmask), const_spec(segmat),
         const_spec(prepped["w_in"])]
        + [layer_spec(prepped[n]) for n in layer_names]
        + [const_spec(prepped[n]) for n in const_names]
    )

    operands = ([src.reshape(B * S, IN_PARAM), inbias, vmask, segmat,
                 prepped["w_in"]]
                + [prepped[n] for n in layer_names]
                + [prepped[n] for n in const_names])

    kernel = functools.partial(transformer_kernel, b_tile=b_tile, seq=S)

    out2d = pl.pallas_call(
        kernel,
        out_shape=jax.ShapeDtypeStruct((B * S, OUT_PAD), jnp.float32),
        grid_spec=pltpu.PrefetchScalarGridSpec(
            num_scalar_prefetch=0,
            grid=grid,
            in_specs=in_specs,
            out_specs=pl.BlockSpec((m_blk, OUT_PAD), lambda b, l: (b, 0)),
            scratch_shapes=[pltpu.VMEM((m_blk, D_MODEL), jnp.float32)],
        ),
        compiler_params=pltpu.CompilerParams(
            dimension_semantics=("parallel", "arbitrary"),
        ),
    )(*operands)
    return out2d[:, :OUT_PARAM].reshape(B, S, OUT_PARAM)


# --------------------------- pure-JAX reference ------------------------------
def reference_forward(src, pe_slice, p):
    B, S, _ = src.shape
    x = src @ p["w_in_t"] + p["b_in"] + pe_slice[None]

    def ln(x, w, b):
        mu = jnp.mean(x, -1, keepdims=True)
        var = jnp.mean((x - mu) ** 2, -1, keepdims=True)
        return (x - mu) * jax.lax.rsqrt(var + LN_EPS) * w + b

    for l in range(NUM_LAYERS):
        qkv = x @ p["wqkv_t"][l] + p["bqkv"][l]
        q, k, v = jnp.split(qkv, 3, axis=-1)
        q = q.reshape(B, S, NHEAD, HEAD_DIM) / math.sqrt(HEAD_DIM)
        k = k.reshape(B, S, NHEAD, HEAD_DIM)
        v = v.reshape(B, S, NHEAD, HEAD_DIM)
        s = jnp.einsum("bshd,bthd->bhst", q, k)
        pmat = jax.nn.softmax(s, axis=-1)
        attn = jnp.einsum("bhst,bthd->bshd", pmat, v).reshape(B, S, D_MODEL)
        attn = attn @ p["wo_t"][l] + p["bo"][l]
        x = ln(x + attn, p["ln1_w"][l], p["ln1_b"][l])
        h = jax.nn.relu(x @ p["w1_t"][l] + p["b1"][l]) @ p["w2_t"][l] + p["b2"][l]
        x = ln(x + h, p["ln2_w"][l], p["ln2_b"][l])
    x = ln(x, p["lnf_w"], p["lnf_b"])
    return x @ p["wg_t"] + p["bg"]


# ----------------------------------- main -------------------------------------
if __name__ == "__main__":
    key = jax.random.PRNGKey(0)
    k_src, k_params = jax.random.split(key)

    src = jax.random.normal(k_src, (BATCH, SEQ, IN_PARAM), dtype=jnp.float32)
    params = init_params(k_params)
    pe_full = make_positional_encoding(D_MODEL, MAX_LEN, STRIDE)
    pe_slice = pe_full[:SEQ, :]   # pe[:, :S, :] after flatten(0,1) -> first S rows

    out = jax.block_until_ready(transformer_refinement(src, pe_slice, params))
    ref = jax.block_until_ready(reference_forward(src, pe_slice, params))

    # kernel uses bf16 weight matmuls with f32 accumulation -> slightly relaxed tol
    np.testing.assert_allclose(np.asarray(out), np.asarray(ref), atol=2e-2, rtol=2e-2)

    assert out.shape == (BATCH, SEQ, OUT_PARAM)
    print("KERNEL_OK")
</pallas_src>

<mosaic_0001>
module attributes {stable_mosaic.version = 11 : i64} {
  func.func @transformer_kernel(%arg0: i32, %arg1: i32, %arg2: memref<16x14xf32, #tpu.memory_space<vmem>>, %arg3: memref<8x128xf32, #tpu.memory_space<vmem>>, %arg4: memref<64x128xf32, #tpu.memory_space<vmem>>, %arg5: memref<64x64xf32, #tpu.memory_space<vmem>>, %arg6: memref<14x128xf32, #tpu.memory_space<vmem>>, %arg7: memref<1x128x384xbf16, #tpu.memory_space<vmem>>, %arg8: memref<1x1x384xf32, #tpu.memory_space<vmem>>, %arg9: memref<1x128x128xbf16, #tpu.memory_space<vmem>>, %arg10: memref<1x1x128xf32, #tpu.memory_space<vmem>>, %arg11: memref<1x1x128xf32, #tpu.memory_space<vmem>>, %arg12: memref<1x1x128xf32, #tpu.memory_space<vmem>>, %arg13: memref<1x128x256xbf16, #tpu.memory_space<vmem>>, %arg14: memref<1x1x256xf32, #tpu.memory_space<vmem>>, %arg15: memref<1x256x128xbf16, #tpu.memory_space<vmem>>, %arg16: memref<1x1x128xf32, #tpu.memory_space<vmem>>, %arg17: memref<1x1x128xf32, #tpu.memory_space<vmem>>, %arg18: memref<1x1x128xf32, #tpu.memory_space<vmem>>, %arg19: memref<1x128xf32, #tpu.memory_space<vmem>>, %arg20: memref<1x128xf32, #tpu.memory_space<vmem>>, %arg21: memref<128x128xf32, #tpu.memory_space<vmem>>, %arg22: memref<1x128xf32, #tpu.memory_space<vmem>>, %arg23: memref<16x128xf32, #tpu.memory_space<vmem>>, %arg24: memref<16x128xf32, #tpu.memory_space<vmem>>) attributes {dimension_semantics = [#tpu.dimension_semantics<parallel>, #tpu.dimension_semantics<arbitrary>], iteration_bounds = array<i64: 1, 8>, scalar_prefetch = 0 : i64, scratch_operands = 1 : i64, tpu.core_type = #tpu.core_type<tc>, window_params = [{transform_indices = @transform_0, window_bounds = array<i64: 16, 14>}, {pipeline_mode = #tpu.pipeline_mode<synchronous>, transform_indices = @transform_1, window_bounds = array<i64: 8, 128>}, {pipeline_mode = #tpu.pipeline_mode<synchronous>, transform_indices = @transform_2, window_bounds = array<i64: 64, 128>}, {pipeline_mode = #tpu.pipeline_mode<synchronous>, transform_indices = @transform_3, window_bounds = array<i64: 64, 64>}, {pipeline_mode = #tpu.pipeline_mode<synchronous>, transform_indices = @transform_4, window_bounds = array<i64: 14, 128>}, {transform_indices = @transform_5, window_bounds = array<i64: 1, 128, 384>}, {transform_indices = @transform_6, window_bounds = array<i64: 1, 1, 384>}, {transform_indices = @transform_7, window_bounds = array<i64: 1, 128, 128>}, {transform_indices = @transform_8, window_bounds = array<i64: 1, 1, 128>}, {transform_indices = @transform_9, window_bounds = array<i64: 1, 1, 128>}, {transform_indices = @transform_10, window_bounds = array<i64: 1, 1, 128>}, {transform_indices = @transform_11, window_bounds = array<i64: 1, 128, 256>}, {transform_indices = @transform_12, window_bounds = array<i64: 1, 1, 256>}, {transform_indices = @transform_13, window_bounds = array<i64: 1, 256, 128>}, {transform_indices = @transform_14, window_bounds = array<i64: 1, 1, 128>}, {transform_indices = @transform_15, window_bounds = array<i64: 1, 1, 128>}, {transform_indices = @transform_16, window_bounds = array<i64: 1, 1, 128>}, {pipeline_mode = #tpu.pipeline_mode<synchronous>, transform_indices = @transform_17, window_bounds = array<i64: 1, 128>}, {pipeline_mode = #tpu.pipeline_mode<synchronous>, transform_indices = @transform_18, window_bounds = array<i64: 1, 128>}, {pipeline_mode = #tpu.pipeline_mode<synchronous>, transform_indices = @transform_19, window_bounds = array<i64: 128, 128>}, {pipeline_mode = #tpu.pipeline_mode<synchronous>, transform_indices = @transform_20, window_bounds = array<i64: 1, 128>}, {transform_indices = @transform_21, window_bounds = array<i64: 16, 128>}]} {
    %c0_i32 = arith.constant 0 : i32
    %0 = arith.cmpi eq, %arg1, %c0_i32 : i32
    %1 = arith.extui %0 : i1 to i32
    %c0_i32_0 = arith.constant 0 : i32
    %2 = arith.cmpi ne, %1, %c0_i32_0 : i32
    scf.if %2 {
      %c0_67 = arith.constant 0 : index
      %c0_68 = arith.constant 0 : index
      %132 = vector.load %arg2[%c0_67, %c0_68] : memref<16x14xf32, #tpu.memory_space<vmem>>, vector<16x14xf32>
      %c0_69 = arith.constant 0 : index
      %c0_70 = arith.constant 0 : index
      %133 = vector.load %arg6[%c0_69, %c0_70] : memref<14x128xf32, #tpu.memory_space<vmem>>, vector<14x128xf32>
      %cst_71 = arith.constant dense<0.000000e+00> : vector<16x128xf32>
      %134 = tpu.matmul %132, %133, %cst_71 {dimension_numbers = #tpu.dot_dimension_numbers<[1], [0], [0], [1], [0, 0, 1, 1], [], []>} : vector<16x14xf32>, vector<14x128xf32>, vector<16x128xf32> -> vector<16x128xf32>
      %c0_72 = arith.constant 0 : index
      %c0_73 = arith.constant 0 : index
      %135 = vector.load %arg3[%c0_72, %c0_73] : memref<8x128xf32, #tpu.memory_space<vmem>>, vector<8x128xf32>
      %136 = tpu.concatenate %135, %135 in 0 : vector<8x128xf32>, vector<8x128xf32> -> vector<16x128xf32>
      %137 = arith.addf %134, %136 : vector<16x128xf32>
      %c0_74 = arith.constant 0 : index
      %c0_75 = arith.constant 0 : index
      %138 = vector.load %arg24[%c0_74, %c0_75] : memref<16x128xf32, #tpu.memory_space<vmem>>, vector<16x128xf32>
      tpu.vector_store %arg24[%c0_74, %c0_75], %137 {strides = array<i32>} : memref<16x128xf32, #tpu.memory_space<vmem>>, vector<16x128xf32>,
    } else {
    }
    %c0 = arith.constant 0 : index
    %c0_1 = arith.constant 0 : index
    %3 = vector.load %arg24[%c0, %c0_1] : memref<16x128xf32, #tpu.memory_space<vmem>>, vector<16x128xf32>
    %c0_2 = arith.constant 0 : index
    %c0_3 = arith.constant 0 : index
    %4 = vector.load %arg4[%c0_2, %c0_3] : memref<64x128xf32, #tpu.memory_space<vmem>>, vector<64x128xf32>
    %c0_4 = arith.constant 0 : index
    %c0_5 = arith.constant 0 : index
    %5 = vector.load %arg5[%c0_4, %c0_5] : memref<64x64xf32, #tpu.memory_space<vmem>>, vector<64x64xf32>
    %6 = arith.truncf %3 : vector<16x128xf32> to vector<16x128xbf16>
    %c0_6 = arith.constant 0 : index
    %c0_7 = arith.constant 0 : index
    %c0_8 = arith.constant 0 : index
    %7 = vector.load %arg7[%c0_6, %c0_7, %c0_8] : memref<1x128x384xbf16, #tpu.memory_space<vmem>>, vector<1x128x384xbf16>
    %8 = vector.shape_cast %7 : vector<1x128x384xbf16> to vector<128x384xbf16>
    %cst = arith.constant dense<0.000000e+00> : vector<16x384xf32>
    %9 = tpu.matmul %6, %8, %cst {dimension_numbers = #tpu.dot_dimension_numbers<[1], [0], [0], [1], [0, 0, 1, 1], [], []>} : vector<16x128xbf16>, vector<128x384xbf16>, vector<16x384xf32> -> vector<16x384xf32>
    %c0_9 = arith.constant 0 : index
    %c0_10 = arith.constant 0 : index
    %c0_11 = arith.constant 0 : index
    %10 = vector.load %arg8[%c0_9, %c0_10, %c0_11] : memref<1x1x384xf32, #tpu.memory_space<vmem>>, vector<1x1x384xf32>
    %11 = vector.shape_cast %10 : vector<1x1x384xf32> to vector<1x384xf32>
    %12 = vector.broadcast %11 : vector<1x384xf32> to vector<16x384xf32>
    %13 = arith.addf %9, %12 : vector<16x384xf32>
    %14 = vector.extract_strided_slice %13 {offsets = [0, 0], sizes = [16, 128], strides = [1, 1]} : vector<16x384xf32> to vector<16x128xf32>
    %15 = vector.extract_strided_slice %13 {offsets = [0, 128], sizes = [16, 128], strides = [1, 1]} : vector<16x384xf32> to vector<16x128xf32>
    %16 = vector.extract_strided_slice %13 {offsets = [0, 256], sizes = [16, 128], strides = [1, 1]} : vector<16x384xf32> to vector<16x128xf32>
    %17 = vector.extract_strided_slice %14 {offsets = [0, 0], sizes = [8, 128], strides = [1, 1]} : vector<16x128xf32> to vector<8x128xf32>
    %18 = vector.extract_strided_slice %15 {offsets = [0, 0], sizes = [8, 128], strides = [1, 1]} : vector<16x128xf32> to vector<8x128xf32>
    %19 = vector.extract_strided_slice %16 {offsets = [0, 0], sizes = [8, 128], strides = [1, 1]} : vector<16x128xf32> to vector<8x128xf32>
    %20 = tpu.concatenate %18, %18, %18, %18, %18, %18, %18, %18 in 0 : vector<8x128xf32>, vector<8x128xf32>, vector<8x128xf32>, vector<8x128xf32>, vector<8x128xf32>, vector<8x128xf32>, vector<8x128xf32>, vector<8x128xf32> -> vector<64x128xf32>
    %21 = arith.mulf %20, %4 : vector<64x128xf32>
    %22 = tpu.concatenate %19, %19, %19, %19, %19, %19, %19, %19 in 0 : vector<8x128xf32>, vector<8x128xf32>, vector<8x128xf32>, vector<8x128xf32>, vector<8x128xf32>, vector<8x128xf32>, vector<8x128xf32>, vector<8x128xf32> -> vector<64x128xf32>
    %23 = arith.mulf %22, %4 : vector<64x128xf32>
    "tpu.trace_start"() <{level = 10 : i32, message = "qd,cd->qc"}> : () -> ()
    %cst_12 = arith.constant dense<0.000000e+00> : vector<8x64xf32>
    %24 = tpu.matmul %17, %21, %cst_12 {dimension_numbers = #tpu.dot_dimension_numbers<[1], [1], [0], [0], [0, 0, 1, 0], [], []>} : vector<8x128xf32>, vector<64x128xf32>, vector<8x64xf32> -> vector<8x64xf32>
    "tpu.trace_stop"() : () -> ()
    %cst_13 = arith.constant dense<0xFF800000> : vector<8xf32>
    %25 = vector.multi_reduction <maximumf>, %24, %cst_13 [1] : vector<8x64xf32> to vector<8xf32>
    %26 = vector.shape_cast %25 : vector<8xf32> to vector<8x1xf32>
    %27 = vector.broadcast %26 : vector<8x1xf32> to vector<8x64xf32>
    %28 = arith.subf %24, %27 : vector<8x64xf32>
    %29 = math.exp %28 : vector<8x64xf32>
    %cst_14 = arith.constant dense<0.000000e+00> : vector<8x64xf32>
    %30 = tpu.matmul %29, %5, %cst_14 {dimension_numbers = #tpu.dot_dimension_numbers<[1], [0], [0], [1], [0, 0, 1, 1], [], []>} : vector<8x64xf32>, vector<64x64xf32>, vector<8x64xf32> -> vector<8x64xf32>
    %31 = tpu.reciprocal %30 {approx = true} : vector<8x64xf32> -> vector<8x64xf32>
    %32 = arith.mulf %29, %31 : vector<8x64xf32>
    %cst_15 = arith.constant dense<0.000000e+00> : vector<8x128xf32>
    %33 = tpu.matmul %32, %23, %cst_15 {dimension_numbers = #tpu.dot_dimension_numbers<[1], [0], [0], [1], [0, 0, 1, 1], [], []>} : vector<8x64xf32>, vector<64x128xf32>, vector<8x128xf32> -> vector<8x128xf32>
    %34 = vector.extract_strided_slice %14 {offsets = [8, 0], sizes = [8, 128], strides = [1, 1]} : vector<16x128xf32> to vector<8x128xf32>
    %35 = vector.extract_strided_slice %15 {offsets = [8, 0], sizes = [8, 128], strides = [1, 1]} : vector<16x128xf32> to vector<8x128xf32>
    %36 = vector.extract_strided_slice %16 {offsets = [8, 0], sizes = [8, 128], strides = [1, 1]} : vector<16x128xf32> to vector<8x128xf32>
    %37 = tpu.concatenate %35, %35, %35, %35, %35, %35, %35, %35 in 0 : vector<8x128xf32>, vector<8x128xf32>, vector<8x128xf32>, vector<8x128xf32>, vector<8x128xf32>, vector<8x128xf32>, vector<8x128xf32>, vector<8x128xf32> -> vector<64x128xf32>
    %38 = arith.mulf %37, %4 : vector<64x128xf32>
    %39 = tpu.concatenate %36, %36, %36, %36, %36, %36, %36, %36 in 0 : vector<8x128xf32>, vector<8x128xf32>, vector<8x128xf32>, vector<8x128xf32>, vector<8x128xf32>, vector<8x128xf32>, vector<8x128xf32>, vector<8x128xf32> -> vector<64x128xf32>
    %40 = arith.mulf %39, %4 : vector<64x128xf32>
    "tpu.trace_start"() <{level = 10 : i32, message = "qd,cd->qc"}> : () -> ()
    %cst_16 = arith.constant dense<0.000000e+00> : vector<8x64xf32>
    %41 = tpu.matmul %34, %38, %cst_16 {dimension_numbers = #tpu.dot_dimension_numbers<[1], [1], [0], [0], [0, 0, 1, 0], [], []>} : vector<8x128xf32>, vector<64x128xf32>, vector<8x64xf32> -> vector<8x64xf32>
    "tpu.trace_stop"() : () -> ()
    %cst_17 = arith.constant dense<0xFF800000> : vector<8xf32>
    %42 = vector.multi_reduction <maximumf>, %41, %cst_17 [1] : vector<8x64xf32> to vector<8xf32>
    %43 = vector.shape_cast %42 : vector<8xf32> to vector<8x1xf32>
    %44 = vector.broadcast %43 : vector<8x1xf32> to vector<8x64xf32>
    %45 = arith.subf %41, %44 : vector<8x64xf32>
    %46 = math.exp %45 : vector<8x64xf32>
    %cst_18 = arith.constant dense<0.000000e+00> : vector<8x64xf32>
    %47 = tpu.matmul %46, %5, %cst_18 {dimension_numbers = #tpu.dot_dimension_numbers<[1], [0], [0], [1], [0, 0, 1, 1], [], []>} : vector<8x64xf32>, vector<64x64xf32>, vector<8x64xf32> -> vector<8x64xf32>
    %48 = tpu.reciprocal %47 {approx = true} : vector<8x64xf32> -> vector<8x64xf32>
    %49 = arith.mulf %46, %48 : vector<8x64xf32>
    %cst_19 = arith.constant dense<0.000000e+00> : vector<8x128xf32>
    %50 = tpu.matmul %49, %40, %cst_19 {dimension_numbers = #tpu.dot_dimension_numbers<[1], [0], [0], [1], [0, 0, 1, 1], [], []>} : vector<8x64xf32>, vector<64x128xf32>, vector<8x128xf32> -> vector<8x128xf32>
    %51 = tpu.concatenate %33, %50 in 0 : vector<8x128xf32>, vector<8x128xf32> -> vector<16x128xf32>
    %52 = arith.truncf %51 : vector<16x128xf32> to vector<16x128xbf16>
    %c0_20 = arith.constant 0 : index
    %c0_21 = arith.constant 0 : index
    %c0_22 = arith.constant 0 : index
    %53 = vector.load %arg9[%c0_20, %c0_21, %c0_22] : memref<1x128x128xbf16, #tpu.memory_space<vmem>>, vector<1x128x128xbf16>
    %54 = vector.shape_cast %53 : vector<1x128x128xbf16> to vector<128x128xbf16>
    %cst_23 = arith.constant dense<0.000000e+00> : vector<16x128xf32>
    %55 = tpu.matmul %52, %54, %cst_23 {dimension_numbers = #tpu.dot_dimension_numbers<[1], [0], [0], [1], [0, 0, 1, 1], [], []>} : vector<16x128xbf16>, vector<128x128xbf16>, vector<16x128xf32> -> vector<16x128xf32>
    %c0_24 = arith.constant 0 : index
    %c0_25 = arith.constant 0 : index
    %c0_26 = arith.constant 0 : index
    %56 = vector.load %arg10[%c0_24, %c0_25, %c0_26] : memref<1x1x128xf32, #tpu.memory_space<vmem>>, vector<1x1x128xf32>
    %57 = vector.shape_cast %56 : vector<1x1x128xf32> to vector<1x128xf32>
    %58 = vector.broadcast %57 : vector<1x128xf32> to vector<16x128xf32>
    %59 = arith.addf %55, %58 : vector<16x128xf32>
    %60 = arith.addf %3, %59 : vector<16x128xf32>
    %c0_27 = arith.constant 0 : index
    %c0_28 = arith.constant 0 : index
    %c0_29 = arith.constant 0 : index
    %61 = vector.load %arg11[%c0_27, %c0_28, %c0_29] : memref<1x1x128xf32, #tpu.memory_space<vmem>>, vector<1x1x128xf32>
    %62 = vector.shape_cast %61 : vector<1x1x128xf32> to vector<1x128xf32>
    %c0_30 = arith.constant 0 : index
    %c0_31 = arith.constant 0 : index
    %c0_32 = arith.constant 0 : index
    %63 = vector.load %arg12[%c0_30, %c0_31, %c0_32] : memref<1x1x128xf32, #tpu.memory_space<vmem>>, vector<1x1x128xf32>
    %64 = vector.shape_cast %63 : vector<1x1x128xf32> to vector<1x128xf32>
    %cst_33 = arith.constant dense<0.000000e+00> : vector<16xf32>
    %65 = vector.multi_reduction <add>, %60, %cst_33 [1] : vector<16x128xf32> to vector<16xf32>
    %66 = vector.shape_cast %65 : vector<16xf32> to vector<16x1xf32>
    %cst_34 = arith.constant 1.280000e+02 : f32
    %67 = vector.broadcast %cst_34 : f32 to vector<16x1xf32>
    %68 = arith.divf %66, %67 : vector<16x1xf32>
    %69 = vector.broadcast %68 : vector<16x1xf32> to vector<16x128xf32>
    %70 = arith.subf %60, %69 : vector<16x128xf32>
    %71 = arith.mulf %70, %70 : vector<16x128xf32>
    %cst_35 = arith.constant dense<0.000000e+00> : vector<16xf32>
    %72 = vector.multi_reduction <add>, %71, %cst_35 [1] : vector<16x128xf32> to vector<16xf32>
    %73 = vector.shape_cast %72 : vector<16xf32> to vector<16x1xf32>
    %cst_36 = arith.constant 1.280000e+02 : f32
    %74 = vector.broadcast %cst_36 : f32 to vector<16x1xf32>
    %75 = arith.divf %73, %74 : vector<16x1xf32>
    %cst_37 = arith.constant 9.99999974E-6 : f32
    %76 = vector.broadcast %cst_37 : f32 to vector<16x1xf32>
    %77 = arith.addf %75, %76 : vector<16x1xf32>
    %78 = math.rsqrt %77 : vector<16x1xf32>
    %79 = vector.broadcast %78 : vector<16x1xf32> to vector<16x128xf32>
    %80 = arith.mulf %70, %79 : vector<16x128xf32>
    %81 = vector.broadcast %62 : vector<1x128xf32> to vector<16x128xf32>
    %82 = arith.mulf %80, %81 : vector<16x128xf32>
    %83 = vector.broadcast %64 : vector<1x128xf32> to vector<16x128xf32>
    %84 = arith.addf %82, %83 : vector<16x128xf32>
    %85 = arith.truncf %84 : vector<16x128xf32> to vector<16x128xbf16>
    %c0_38 = arith.constant 0 : index
    %c0_39 = arith.constant 0 : index
    %c0_40 = arith.constant 0 : index
    %86 = vector.load %arg13[%c0_38, %c0_39, %c0_40] : memref<1x128x256xbf16, #tpu.memory_space<vmem>>, vector<1x128x256xbf16>
    %87 = vector.shape_cast %86 : vector<1x128x256xbf16> to vector<128x256xbf16>
    %cst_41 = arith.constant dense<0.000000e+00> : vector<16x256xf32>
    %88 = tpu.matmul %85, %87, %cst_41 {dimension_numbers = #tpu.dot_dimension_numbers<[1], [0], [0], [1], [0, 0, 1, 1], [], []>} : vector<16x128xbf16>, vector<128x256xbf16>, vector<16x256xf32> -> vector<16x256xf32>
    %c0_42 = arith.constant 0 : index
    %c0_43 = arith.constant 0 : index
    %c0_44 = arith.constant 0 : index
    %89 = vector.load %arg14[%c0_42, %c0_43, %c0_44] : memref<1x1x256xf32, #tpu.memory_space<vmem>>, vector<1x1x256xf32>
    %90 = vector.shape_cast %89 : vector<1x1x256xf32> to vector<1x256xf32>
    %91 = vector.broadcast %90 : vector<1x256xf32> to vector<16x256xf32>
    %92 = arith.addf %88, %91 : vector<16x256xf32>
    %cst_45 = arith.constant 0.000000e+00 : f32
    %93 = vector.broadcast %cst_45 : f32 to vector<16x256xf32>
    %94 = arith.maximumf %92, %93 : vector<16x256xf32>
    %95 = arith.truncf %94 : vector<16x256xf32> to vector<16x256xbf16>
    %c0_46 = arith.constant 0 : index
    %c0_47 = arith.constant 0 : index
    %c0_48 = arith.constant 0 : index
    %96 = vector.load %arg15[%c0_46, %c0_47, %c0_48] : memref<1x256x128xbf16, #tpu.memory_space<vmem>>, vector<1x256x128xbf16>
    %97 = vector.shape_cast %96 : vector<1x256x128xbf16> to vector<256x128xbf16>
    %cst_49 = arith.constant dense<0.000000e+00> : vector<16x128xf32>
    %98 = tpu.matmul %95, %97, %cst_49 {dimension_numbers = #tpu.dot_dimension_numbers<[1], [0], [0], [1], [0, 0, 1, 1], [], []>} : vector<16x256xbf16>, vector<256x128xbf16>, vector<16x128xf32> -> vector<16x128xf32>
    %c0_50 = arith.constant 0 : index
    %c0_51 = arith.constant 0 : index
    %c0_52 = arith.constant 0 : index
    %99 = vector.load %arg16[%c0_50, %c0_51, %c0_52] : memref<1x1x128xf32, #tpu.memory_space<vmem>>, vector<1x1x128xf32>
    %100 = vector.shape_cast %99 : vector<1x1x128xf32> to vector<1x128xf32>
    %101 = vector.broadcast %100 : vector<1x128xf32> to vector<16x128xf32>
    %102 = arith.addf %98, %101 : vector<16x128xf32>
    %103 = arith.addf %84, %102 : vector<16x128xf32>
    %c0_53 = arith.constant 0 : index
    %c0_54 = arith.constant 0 : index
    %c0_55 = arith.constant 0 : index
    %104 = vector.load %arg17[%c0_53, %c0_54, %c0_55] : memref<1x1x128xf32, #tpu.memory_space<vmem>>, vector<1x1x128xf32>
    %105 = vector.shape_cast %104 : vector<1x1x128xf32> to vector<1x128xf32>
    %c0_56 = arith.constant 0 : index
    %c0_57 = arith.constant 0 : index
    %c0_58 = arith.constant 0 : index
    %106 = vector.load %arg18[%c0_56, %c0_57, %c0_58] : memref<1x1x128xf32, #tpu.memory_space<vmem>>, vector<1x1x128xf32>
    %107 = vector.shape_cast %106 : vector<1x1x128xf32> to vector<1x128xf32>
    %cst_59 = arith.constant dense<0.000000e+00> : vector<16xf32>
    %108 = vector.multi_reduction <add>, %103, %cst_59 [1] : vector<16x128xf32> to vector<16xf32>
    %109 = vector.shape_cast %108 : vector<16xf32> to vector<16x1xf32>
    %cst_60 = arith.constant 1.280000e+02 : f32
    %110 = vector.broadcast %cst_60 : f32 to vector<16x1xf32>
    %111 = arith.divf %109, %110 : vector<16x1xf32>
    %112 = vector.broadcast %111 : vector<16x1xf32> to vector<16x128xf32>
    %113 = arith.subf %103, %112 : vector<16x128xf32>
    %114 = arith.mulf %113, %113 : vector<16x128xf32>
    %cst_61 = arith.constant dense<0.000000e+00> : vector<16xf32>
    %115 = vector.multi_reduction <add>, %114, %cst_61 [1] : vector<16x128xf32> to vector<16xf32>
    %116 = vector.shape_cast %115 : vector<16xf32> to vector<16x1xf32>
    %cst_62 = arith.constant 1.280000e+02 : f32
    %117 = vector.broadcast %cst_62 : f32 to vector<16x1xf32>
    %118 = arith.divf %116, %117 : vector<16x1xf32>
    %cst_63 = arith.constant 9.99999974E-6 : f32
    %119 = vector.broadcast %cst_63 : f32 to vector<16x1xf32>
    %120 = arith.addf %118, %119 : vector<16x1xf32>
    %121 = math.rsqrt %120 : vector<16x1xf32>
    %122 = vector.broadcast %121 : vector<16x1xf32> to vector<16x128xf32>
    %123 = arith.mulf %113, %122 : vector<16x128xf32>
    %124 = vector.broadcast %105 : vector<1x128xf32> to vector<16x128xf32>
    %125 = arith.mulf %123, %124 : vector<16x128xf32>
    %126 = vector.broadcast %107 : vector<1x128xf32> to vector<16x128xf32>
    %127 = arith.addf %125, %126 : vector<16x128xf32>
    %c0_64 = arith.constant 0 : index
    %c0_65 = arith.constant 0 : index
    %128 = vector.load %arg24[%c0_64, %c0_65] : memref<16x128xf32, #tpu.memory_space<vmem>>, vector<16x128xf32>
    tpu.vector_store %arg24[%c0_64, %c0_65], %127 {strides = array<i32>} : memref<16x128xf32, #tpu.memory_space<vmem>>, vector<16x128xf32>,
    %c7_i32 = arith.constant 7 : i32
    %129 = arith.cmpi eq, %arg1, %c7_i32 : i32
    %130 = arith.extui %129 : i1 to i32
    %c0_i32_66 = arith.constant 0 : i32
    %131 = arith.cmpi ne, %130, %c0_i32_66 : i32
    scf.if %131 {
      %c0_67 = arith.constant 0 : index
      %c0_68 = arith.constant 0 : index
      %132 = vector.load %arg19[%c0_67, %c0_68] : memref<1x128xf32, #tpu.memory_space<vmem>>, vector<1x128xf32>
      %c0_69 = arith.constant 0 : index
      %c0_70 = arith.constant 0 : index
      %133 = vector.load %arg20[%c0_69, %c0_70] : memref<1x128xf32, #tpu.memory_space<vmem>>, vector<1x128xf32>
      %cst_71 = arith.constant dense<0.000000e+00> : vector<16xf32>
      %134 = vector.multi_reduction <add>, %127, %cst_71 [1] : vector<16x128xf32> to vector<16xf32>
      %135 = vector.shape_cast %134 : vector<16xf32> to vector<16x1xf32>
      %cst_72 = arith.constant 1.280000e+02 : f32
      %136 = vector.broadcast %cst_72 : f32 to vector<16x1xf32>
      %137 = arith.divf %135, %136 : vector<16x1xf32>
      %138 = vector.broadcast %137 : vector<16x1xf32> to vector<16x128xf32>
      %139 = arith.subf %127, %138 : vector<16x128xf32>
      %140 = arith.mulf %139, %139 : vector<16x128xf32>
      %cst_73 = arith.constant dense<0.000000e+00> : vector<16xf32>
      %141 = vector.multi_reduction <add>, %140, %cst_73 [1] : vector<16x128xf32> to vector<16xf32>
      %142 = vector.shape_cast %141 : vector<16xf32> to vector<16x1xf32>
      %cst_74 = arith.constant 1.280000e+02 : f32
      %143 = vector.broadcast %cst_74 : f32 to vector<16x1xf32>
      %144 = arith.divf %142, %143 : vector<16x1xf32>
      %cst_75 = arith.constant 9.99999974E-6 : f32
      %145 = vector.broadcast %cst_75 : f32 to vector<16x1xf32>
      %146 = arith.addf %144, %145 : vector<16x1xf32>
      %147 = math.rsqrt %146 : vector<16x1xf32>
      %148 = vector.broadcast %147 : vector<16x1xf32> to vector<16x128xf32>
      %149 = arith.mulf %139, %148 : vector<16x128xf32>
      %150 = vector.broadcast %132 : vector<1x128xf32> to vector<16x128xf32>
      %151 = arith.mulf %149, %150 : vector<16x128xf32>
      %152 = vector.broadcast %133 : vector<1x128xf32> to vector<16x128xf32>
      %153 = arith.addf %151, %152 : vector<16x128xf32>
      %c0_76 = arith.constant 0 : index
      %c0_77 = arith.constant 0 : index
      %154 = vector.load %arg21[%c0_76, %c0_77] : memref<128x128xf32, #tpu.memory_space<vmem>>, vector<128x128xf32>
      %cst_78 = arith.constant dense<0.000000e+00> : vector<16x128xf32>
      %155 = tpu.matmul %153, %154, %cst_78 {dimension_numbers = #tpu.dot_dimension_numbers<[1], [0], [0], [1], [0, 0, 1, 1], [], []>} : vector<16x128xf32>, vector<128x128xf32>, vector<16x128xf32> -> vector<16x128xf32>
      %c0_79 = arith.constant 0 : index
      %c0_80 = arith.constant 0 : index
      %156 = vector.load %arg22[%c0_79, %c0_80] : memref<1x128xf32, #tpu.memory_space<vmem>>, vector<1x128xf32>
      %157 = vector.broadcast %156 : vector<1x128xf32> to vector<16x128xf32>
      %158 = arith.addf %155, %157 : vector<16x128xf32>
      %c0_81 = arith.constant 0 : index
      %c0_82 = arith.constant 0 : index
      %159 = vector.load %arg23[%c0_81, %c0_82] : memref<16x128xf32, #tpu.memory_space<vmem>>, vector<16x128xf32>
      tpu.vector_store %arg23[%c0_81, %c0_82], %158 {strides = array<i32>} : memref<16x128xf32, #tpu.memory_space<vmem>>, vector<16x128xf32>,
    } else {
    }
    return
  }
  func.func @transform_0(%arg0: i32, %arg1: i32) -> (i32, i32) {
    %c0_i32 = arith.constant 0 : i32
    %c0_i32_0 = arith.constant 0 : i32
    return %arg0, %c0_i32 : i32, i32
  }
  func.func @transform_1(%arg0: i32, %arg1: i32) -> (i32, i32) {
    %c0_i32 = arith.constant 0 : i32
    %c0_i32_0 = arith.constant 0 : i32
    %c0_i32_1 = arith.constant 0 : i32
    return %c0_i32, %c0_i32_0 : i32, i32
  }
  func.func @transform_2(%arg0: i32, %arg1: i32) -> (i32, i32) {
    %c0_i32 = arith.constant 0 : i32
    %c0_i32_0 = arith.constant 0 : i32
    %c0_i32_1 = arith.constant 0 : i32
    return %c0_i32, %c0_i32_0 : i32, i32
  }
  func.func @transform_3(%arg0: i32, %arg1: i32) -> (i32, i32) {
    %c0_i32 = arith.constant 0 : i32
    %c0_i32_0 = arith.constant 0 : i32
    %c0_i32_1 = arith.constant 0 : i32
    return %c0_i32, %c0_i32_0 : i32, i32
  }
  func.func @transform_4(%arg0: i32, %arg1: i32) -> (i32, i32) {
    %c0_i32 = arith.constant 0 : i32
    %c0_i32_0 = arith.constant 0 : i32
    %c0_i32_1 = arith.constant 0 : i32
    return %c0_i32, %c0_i32_0 : i32, i32
  }
  func.func @transform_5(%arg0: i32, %arg1: i32) -> (i32, i32, i32) {
    %c0_i32 = arith.constant 0 : i32
    %c0_i32_0 = arith.constant 0 : i32
    %c0_i32_1 = arith.constant 0 : i32
    return %arg1, %c0_i32, %c0_i32_0 : i32, i32, i32
  }
  func.func @transform_6(%arg0: i32, %arg1: i32) -> (i32, i32, i32) {
    %c0_i32 = arith.constant 0 : i32
    %c0_i32_0 = arith.constant 0 : i32
    %c0_i32_1 = arith.constant 0 : i32
    return %arg1, %c0_i32, %c0_i32_0 : i32, i32, i32
  }
  func.func @transform_7(%arg0: i32, %arg1: i32) -> (i32, i32, i32) {
    %c0_i32 = arith.constant 0 : i32
    %c0_i32_0 = arith.constant 0 : i32
    %c0_i32_1 = arith.constant 0 : i32
    return %arg1, %c0_i32, %c0_i32_0 : i32, i32, i32
  }
  func.func @transform_8(%arg0: i32, %arg1: i32) -> (i32, i32, i32) {
    %c0_i32 = arith.constant 0 : i32
    %c0_i32_0 = arith.constant 0 : i32
    %c0_i32_1 = arith.constant 0 : i32
    return %arg1, %c0_i32, %c0_i32_0 : i32, i32, i32
  }
  func.func @transform_9(%arg0: i32, %arg1: i32) -> (i32, i32, i32) {
    %c0_i32 = arith.constant 0 : i32
    %c0_i32_0 = arith.constant 0 : i32
    %c0_i32_1 = arith.constant 0 : i32
    return %arg1, %c0_i32, %c0_i32_0 : i32, i32, i32
  }
  func.func @transform_10(%arg0: i32, %arg1: i32) -> (i32, i32, i32) {
    %c0_i32 = arith.constant 0 : i32
    %c0_i32_0 = arith.constant 0 : i32
    %c0_i32_1 = arith.constant 0 : i32
    return %arg1, %c0_i32, %c0_i32_0 : i32, i32, i32
  }
  func.func @transform_11(%arg0: i32, %arg1: i32) -> (i32, i32, i32) {
    %c0_i32 = arith.constant 0 : i32
    %c0_i32_0 = arith.constant 0 : i32
    %c0_i32_1 = arith.constant 0 : i32
    return %arg1, %c0_i32, %c0_i32_0 : i32, i32, i32
  }
  func.func @transform_12(%arg0: i32, %arg1: i32) -> (i32, i32, i32) {
    %c0_i32 = arith.constant 0 : i32
    %c0_i32_0 = arith.constant 0 : i32
    %c0_i32_1 = arith.constant 0 : i32
    return %arg1, %c0_i32, %c0_i32_0 : i32, i32, i32
  }
  func.func @transform_13(%arg0: i32, %arg1: i32) -> (i32, i32, i32) {
    %c0_i32 = arith.constant 0 : i32
    %c0_i32_0 = arith.constant 0 : i32
    %c0_i32_1 = arith.constant 0 : i32
    return %arg1, %c0_i32, %c0_i32_0 : i32, i32, i32
  }
  func.func @transform_14(%arg0: i32, %arg1: i32) -> (i32, i32, i32) {
    %c0_i32 = arith.constant 0 : i32
    %c0_i32_0 = arith.constant 0 : i32
    %c0_i32_1 = arith.constant 0 : i32
    return %arg1, %c0_i32, %c0_i32_0 : i32, i32, i32
  }
  func.func @transform_15(%arg0: i32, %arg1: i32) -> (i32, i32, i32) {
    %c0_i32 = arith.constant 0 : i32
    %c0_i32_0 = arith.constant 0 : i32
    %c0_i32_1 = arith.constant 0 : i32
    return %arg1, %c0_i32, %c0_i32_0 : i32, i32, i32
  }
  func.func @transform_16(%arg0: i32, %arg1: i32) -> (i32, i32, i32) {
    %c0_i32 = arith.constant 0 : i32
    %c0_i32_0 = arith.constant 0 : i32
    %c0_i32_1 = arith.constant 0 : i32
    return %arg1, %c0_i32, %c0_i32_0 : i32, i32, i32
  }
  func.func @transform_17(%arg0: i32, %arg1: i32) -> (i32, i32) {
    %c0_i32 = arith.constant 0 : i32
    %c0_i32_0 = arith.constant 0 : i32
    %c0_i32_1 = arith.constant 0 : i32
    return %c0_i32, %c0_i32_0 : i32, i32
  }
  func.func @transform_18(%arg0: i32, %arg1: i32) -> (i32, i32) {
    %c0_i32 = arith.constant 0 : i32
    %c0_i32_0 = arith.constant 0 : i32
    %c0_i32_1 = arith.constant 0 : i32
    return %c0_i32, %c0_i32_0 : i32, i32
  }
  func.func @transform_19(%arg0: i32, %arg1: i32) -> (i32, i32) {
    %c0_i32 = arith.constant 0 : i32
    %c0_i32_0 = arith.constant 0 : i32
    %c0_i32_1 = arith.constant 0 : i32
    return %c0_i32, %c0_i32_0 : i32, i32
  }
  func.func @transform_20(%arg0: i32, %arg1: i32) -> (i32, i32) {
    %c0_i32 = arith.constant 0 : i32
    %c0_i32_0 = arith.constant 0 : i32
    %c0_i32_1 = arith.constant 0 : i32
    return %c0_i32, %c0_i32_0 : i32, i32
  }
  func.func @transform_21(%arg0: i32, %arg1: i32) -> (i32, i32) {
    %c0_i32 = arith.constant 0 : i32
    %c0_i32_0 = arith.constant 0 : i32
    return %arg0, %c0_i32 : i32, i32
  }
}

</mosaic_0001>

<bundles_post_ra>
// kernel: tpu_custom_call.1
= control target key start
LH: loop header
LB: loop body
LE: loop exit
PB: predicated region body
PF: predicated region fallthrough
CT: control target
= control target key end

     0   :  { %s4497_s0 = inlined_call_operand.hbm [shape: f32[16,14], index: 0, kind: input, shape index: {}]   ;;  %s4498_s1 = inlined_call_operand.hbm [shape: f32[8,128], index: 1, kind: input, shape index: {}]   ;;  %s4499_s2 = inlined_call_operand.hbm [shape: f32[64,128], index: 2, kind: input, shape index: {}]   ;;  %s4500_s3 = inlined_call_operand.hbm [shape: f32[64,64], index: 3, kind: input, shape index: {}]   ;;  %s4501_s4 = inlined_call_operand.hbm [shape: f32[14,128], index: 4, kind: input, shape index: {}]   ;;  %s4502_s5 = inlined_call_operand.hbm [shape: bf16[8,128,384], index: 5, kind: input, shape index: {}]   ;;  %s4503_s6 = inlined_call_operand.hbm [shape: f32[8,1,384], index: 6, kind: input, shape index: {}]   ;;  %s4504_s7 = inlined_call_operand.hbm [shape: bf16[8,128,128], index: 7, kind: input, shape index: {}]   ;;  %s4505_s8 = inlined_call_operand.hbm [shape: f32[8,1,128], index: 8, kind: input, shape index: {}]   ;;  %s4506_s9 = inlined_call_operand.vmem [shape: f32[8,1,128], index: 9, kind: input, shape index: {}]   ;;  %s4507_s10 = inlined_call_operand.hbm [shape: f32[8,1,128], index: 10, kind: input, shape index: {}]   ;;  %s4508_s11 = inlined_call_operand.hbm [shape: bf16[8,128,256], index: 11, kind: input, shape index: {}]   ;;  %s4509_s12 = inlined_call_operand.hbm [shape: f32[8,1,256], index: 12, kind: input, shape index: {}]   ;;  %s4510_s13 = inlined_call_operand.hbm [shape: bf16[8,256,128], index: 13, kind: input, shape index: {}]   ;;  %s4511_s14 = inlined_call_operand.hbm [shape: f32[8,1,128], index: 14, kind: input, shape index: {}]   ;;  %s4512_s15 = inlined_call_operand.hbm [shape: f32[8,1,128], index: 15, kind: input, shape index: {}]   ;;  %s4513_s16 = inlined_call_operand.hbm [shape: f32[8,1,128], index: 16, kind: input, shape index: {}]   ;;  %s4514_s17 = inlined_call_operand.vmem [shape: f32[1,128], index: 17, kind: input, shape index: {}]   ;;  %s4515_s18 = inlined_call_operand.vmem [shape: f32[1,128], index: 18, kind: input, shape index: {}]   ;;  %s4516_s19 = inlined_call_operand.hbm [shape: f32[128,128], index: 19, kind: input, shape index: {}]   ;;  %s4517_s20 = inlined_call_operand.vmem [shape: f32[1,128], index: 20, kind: input, shape index: {}]   ;;  %s4518_s21 = inlined_call_operand.hbm [shape: f32[16,128], index: 21, kind: output, shape index: {}]  }
   0x1   :  { %4539 = sst [smem:[#allocation51_spill]] %s4497_s0 }
   0x2   :  { %4540 = sst [smem:[#allocation52_spill]] %s4498_s1 }
   0x3   :  { %4541 = sst [smem:[#allocation53_spill]] %s4499_s2 }
   0x4   :  { %4542 = sst [smem:[#allocation54_spill]] %s4500_s3 }
   0x5   :  { %4543 = sst [smem:[#allocation55_spill]] %s4501_s4 }
   0x6   :  { %4544 = sst [smem:[#allocation56_spill]] %s4502_s5 }
   0x7   :  { %4545 = sst [smem:[#allocation57_spill]] %s4503_s6 }
   0x8   :  { %4546 = sst [smem:[#allocation58_spill]] %s4506_s9 }
   0x9   :  { %4547 = sst [smem:[#allocation59_spill]] %s4514_s17 }
   0xa   :  { %4548 = sst [smem:[#allocation60_spill]] %s4515_s18 }
   0xb   :  { %4549 = sst [smem:[#allocation61_spill]] %s4516_s19 }
   0xc   :  { %4550 = sst [smem:[#allocation62_spill]] %s4517_s20 }
   0xd   :  { %4551 = sst [smem:[#allocation63_spill]] %s4518_s21 }
   0xe   :  { %26 = vsyncpa [#allocation4], 0 }
   0xf   :  { %27 = vsyncpa [#allocation7], 0 }
  0x10   :  { %28 = vsyncpa [#allocation10], 0 }
  0x11   :  { %29 = vsyncpa [#allocation13], 0 }
  0x12   :  { %31 = vsyncpa [#allocation13 + $0x1], 0 }
  0x13   :  { %32 = vsyncpa [#allocation16], 0 }
  0x14   :  { %34 = vsyncpa [#allocation16 + $0x1], 0 }
  0x15   :  { %35 = vsyncpa [#allocation19], 0 }
  0x16   :  { %37 = vsyncpa [#allocation19 + $0x1], 0 }
  0x17   :  { %38 = vsyncpa [#allocation22], 0 }
  0x18   :  { %40 = vsyncpa [#allocation22 + $0x1], 0 }
  0x19   :  { %41 = vsyncpa [#allocation25], 0 }
  0x1a   :  { %43 = vsyncpa [#allocation25 + $0x1], 0 }
  0x1b   :  { %44 = vsyncpa [#allocation28], 0 }
  0x1c   :  { %46 = vsyncpa [#allocation28 + $0x1], 0 }
  0x1d   :  { %47 = vsyncpa [#allocation5], 0  ;;  %s3921_s2 = smov 0   ;;  %s3923_s25 = smov 0  }
  0x1e   :  { %s3925_s26 = smov 0   ;;  %s3927_s27 = smov 0  }
  0x1f   :  { %s3929_s3 = smov 0   ;;  %s3931_s28 = smov 0  }
  0x20 LB: > { %4552 = sst [smem:[#allocation42_spill]] %s3777_s25  ;;  %s3950_s29 = sadd.s32 4294967295, %s3793_s28   ;;  %s3793_s28 = sphi %s3931_s28, %s53_s28   ;;  %s3789_s3 = sphi %s3929_s3, %s4601_s3   ;;  %s3785_s27 = sphi %s3927_s27, %s4600_s27   ;;  %s3781_s26 = sphi %s3925_s26, %s4598_s26   ;;  %s3777_s25 = sphi %s3923_s25, %s4597_s25   ;;  %s3773_s2 = sphi %s3921_s2, %s4596_s2  }
  0x21   : > { %4553 = sst [smem:[#allocation43_spill]] %s3781_s26  ;;  %s62_s0 = sadd.s32 1, %s3789_s3 }
  0x22   : > { %4554 = sst [smem:[#allocation44_spill]] %s3785_s27  ;;  %p63_p0 = scmp.ge.s32.totalorder %s62_s0, 8 }
  0x23   : > { %4555 = sst [smem:[#allocation45_spill]] %s3793_s28  ;;  %s182_s4 = sadd.s32 1, %s3781_s26 }
  0x24   : > { %4556 = sst [smem:[#allocation46_spill]] %s3950_s29  ;;  %p189_p1 = scmp.ne.s32.totalorder %s3781_s26, %s3777_s25 }
  0x25   : > { %p190_p2 = scmp.eq.s32.totalorder %s3793_s28, 0  ;;  %s4603_s0 = smov (%p63_p0, %s62_s0), 0 }
  0x26   : > { %4557 = sst [smem:[#allocation47_spill]] %s4603_s0  ;;  %p195_p4 = scmp.ne.s32.totalorder %s3777_s25, %s3773_s2 }
  0x27   : > { %p3959_p3 = por %p190_p2, %p189_p1  ;;  %s179_s5 = ssub.s32 %s3789_s3, %s4603_s0 }
  0x28   : > { %p196_p5 = scmp.eq.s32.totalorder %s3950_s29, 0  ;;  %p180_p6 = scmp.eq.s32.totalorder %s179_s5, 0 }
  0x29   : > { %p2561_p7 = scmp.ge.s32.totalorder %s3793_s28, 1  ;;  %p602_p9 = scmp.lt.s32.totalorder %s3793_s28, 9 }
  0x2a   : > { %p3970_p8 = por %p196_p5, %p195_p4  ;;  %s4564_s21 = sld [smem:[#allocation52_spill]] }
  0x2b   : > { %s3976_s23 = scalar_select %p180_p6, %s3781_s26, %s182_s4  }
  0x2c   : > { %s4559_s22 = scalar_select %p3970_p8, 1, 0 }
  0x2d   : > { %4561 = sst [smem:[#allocation49_spill]] %s3976_s23  ;;  %p3978_p10 = pnand %p2561_p7, %p602_p9 }
  0x2e   : > { %4560 = sst [smem:[#allocation48_spill]] %s4559_s22  ;;  %s3795_s5 = smov [#allocation6]  }
  0x2f   : > { %s4562_s1 = scalar_select %p3978_p10, 1, 0 }
  0x30   : > { %s631_s0 = sshll.u32 %s4564_s21, 4  ;;  %p3002_p11 = pneg %p3978_p10  ;;  %s632_s0 = int_to_ptr.hbm [resolvable:$true] %s631_s0 }
  0x31   : > { %4563 = sst [smem:[#allocation50_spill]] %s4562_s1  ;;  %s633_s20 = sshll.u32 %s3795_s5, 4  ;;  %s634_s20 = int_to_ptr.vmem [resolvable:$true] %s633_s20 }
  0x32   : > { %p3989_p12 = pnand %p3002_p11, %p196_p5  ;;  %p3061_p13 = scmp.lt.s32.totalorder %s3793_s28, 8 }
  0x33   : > { %s4567_s2 = sld [smem:[#allocation54_spill]]  ;;  %s3796_s23 = smov [#allocation9]  }
  0x34   : > { %3008 = dma.hbm_to_vmem [thread:$0]  (!%p3989_p12), %s632_s0, 128, %s634_s20, [#allocation7]  }
  0x35   : > { %p3998_p0 = pnand %p3061_p13, %p3959_p3  ;;  %s658_s17 = sshll.u32 %s3796_s23, 4  ;;  %s659_s17 = int_to_ptr.vmem [resolvable:$true] %s658_s17 }
  0x36   : > { %s4568_s19 = sld [smem:[#allocation61_spill]]  ;;  %s4527_s0 = smov 128  }
  0x37   : > { %s4529_s30 = smov 8   ;;  %s3799_s4 = smov [#allocation29]  }
  0x38   : > { %s692_s24 = sshll.u32 %s3799_s4, 4  ;;  %s4022_s9 = sand.u32 1, %s3781_s26   ;;  %s693_s24 = int_to_ptr.vmem [resolvable:$true] %s692_s24 }
  0x39   : > { %s656_s5 = sshll.u32 %s4567_s2, 4  ;;  %s4014_s2 = sand.u32 1, %s3793_s28   ;;  %s657_s5 = int_to_ptr.hbm [resolvable:$true] %s656_s5 }
  0x3a   : > { %3014 = dma.hbm_to_vmem [thread:$0]  (!%p3989_p12), %s657_s5, 1024, %s659_s17, [#allocation10], %s4527_s0, %s4527_s0, %s4529_s30  }
  0x3b   : > { %s2947_s17 = smul.u32 192, %s3789_s3  ;;  %s4569_s4 = sld [smem:[#allocation56_spill]] }
  0x3c   : > { %s690_s20 = sshll.u32 %s4568_s19, 4  ;;  %s2946_s27 = smul.u32 192, %s4022_s9  ;;  %s691_s20 = int_to_ptr.hbm [resolvable:$true] %s690_s20 }
  0x3d   : > { %3020 = dma.hbm_to_vmem [thread:$0]  (!%p3989_p12), %s691_s20, 2048, %s693_s24, [#allocation28], %s4527_s0, %s4527_s0, %s4529_s30  }
  0x3e   : > { %s713_s22 = scalar_lea.vmem [#allocation12], %s2946_s27  ;;  %s710_s29 = scalar_lea.sflag [#allocation13], %s4014_s2 }
  0x3f   : > { %s721_s25 = sshll.u32 %s713_s22, 4  ;;  %s3800_s20 = smov 192   ;;  %s722_s25 = int_to_ptr.vmem [resolvable:$true] %s721_s25 }
  0x40   : > { %s3801_s24 = smov 12   ;;  %s2570_s0 = sshll.u32 %s4022_s9, 6 }
  0x41   : > { %s718_s19 = scalar_lea.hbm %s4569_s4, %s2947_s17  ;;  %s2861_s30 = sshll.u32 %s3789_s3, 6 }
  0x42   : > { %s719_s28 = sshll.u32 %s718_s19, 4  ;;  %s759_s19 = scalar_lea.hbm %s4504_s7, %s2861_s30  ;;  %s720_s28 = int_to_ptr.hbm [resolvable:$true] %s719_s28 }
  0x43   : > { %3024 = dma.hbm_to_vmem [thread:$0]  (!%p3998_p0), %s720_s28, 3072, %s722_s25, %s710_s29, %s3800_s20, %s3800_s20, %s3801_s24  }
  0x44   : > { %s760_s27 = sshll.u32 %s759_s19, 4  ;;  %s754_s22 = scalar_lea.vmem [#allocation15], %s2570_s0  ;;  %s761_s27 = int_to_ptr.hbm [resolvable:$true] %s760_s27 }
  0x45   : > { %s762_s5 = sshll.u32 %s754_s22, 4  ;;  %s4537_s4 = scalar_lea.sflag [#allocation16], %s4014_s2  ;;  %s763_s5 = int_to_ptr.vmem [resolvable:$true] %s762_s5 }
  0x46   : > { %s4533_s26 = smov 64   ;;  %s4534_s1 = smov 4  }
  0x47   : > { %3030 = dma.hbm_to_vmem [thread:$0]  (!%p3998_p0), %s761_s27, 1024, %s763_s5, %s4537_s4, %s4533_s26, %s4533_s26, %s4534_s1  }
  0x48   : > { %s801_s30 = scalar_lea.hbm %s4507_s10, %s3789_s3  ;;  %s798_s0 = scalar_lea.vmem [#allocation18], %s4022_s9 }
  0x49   : > { %s805_s20 = sshll.u32 %s798_s0, 4  ;;  %s803_s24 = sshll.u32 %s801_s30, 4  ;;  %s806_s20 = int_to_ptr.vmem [resolvable:$true] %s805_s20  ;;  %s804_s24 = int_to_ptr.hbm [resolvable:$true] %s803_s24 }
  0x4a   : > { %s4535_s23 = scalar_lea.sflag [#allocation19], %s4014_s2  ;;  %s2576_s17 = sshll.u32 %s4022_s9, 1 }
  0x4b   : > { %3036 = dma.hbm_to_vmem [thread:$0]  (!%p3998_p0), %s804_s24, 16, %s806_s20, %s4535_s23  }
  0x4c   : > { %s2577_s19 = sshll.u32 %s3789_s3, 1  ;;  %s838_s28 = scalar_lea.vmem [#allocation21], %s2576_s17 }
  0x4d   : > { %s842_s5 = scalar_lea.hbm %s4509_s12, %s2577_s19  ;;  %s846_s0 = sshll.u32 %s838_s28, 4  ;;  %s847_s0 = int_to_ptr.vmem [resolvable:$true] %s846_s0 }
  0x4e   : > { %s844_s25 = sshll.u32 %s842_s5, 4  ;;  %s4536_s30 = scalar_lea.sflag [#allocation22], %s4014_s2  ;;  %s845_s25 = int_to_ptr.hbm [resolvable:$true] %s844_s25 }
  0x4f   : > { %3042 = dma.hbm_to_vmem [thread:$0]  (!%p3998_p0), %s845_s25, 32, %s847_s0, %s4536_s30  }
  0x50   : > { %s881_s24 = scalar_lea.hbm %s4511_s14, %s3789_s3  ;;  %s878_s1 = scalar_lea.vmem [#allocation24], %s4022_s9 }
  0x51   : > { %s885_s23 = sshll.u32 %s878_s1, 4  ;;  %s883_s27 = sshll.u32 %s881_s24, 4  ;;  %s886_s23 = int_to_ptr.vmem [resolvable:$true] %s885_s23  ;;  %s884_s27 = int_to_ptr.hbm [resolvable:$true] %s883_s27 }
  0x52   : > { %s4538_s19 = scalar_lea.sflag [#allocation25], %s4014_s2  ;;  %s4570_s5 = sld [smem:[#allocation51_spill]] }
  0x53   : > { %3048 = dma.hbm_to_vmem [thread:$0]  (!%p3998_p0), %s884_s27, 16, %s886_s23, %s4538_s19  }
  0x54   : > { %s3804_s25 = smov [#allocation3]   ;;  %s4571_s1 = sld [smem:[#allocation53_spill]] }
  0x55   : > { %s618_s26 = sshll.u32 %s3804_s25, 4  ;;  %s4572_s30 = smov 8   ;;  %s619_s26 = int_to_ptr.vmem [resolvable:$true] %s618_s26 }
  0x56   : > { %s4573_s4 = smov 128   ;;  %s4574_s17 = sld [smem:[#allocation55_spill]] }
  0x57   : > { %s3806_s25 = smov [#allocation11]   ;;  %s4575_s6 = sld [smem:[#allocation57_spill]] }
  0x58   : > { %s616_s28 = sshll.u32 %s4570_s5, 4  ;;  %s3805_s5 = smov [#allocation8]   ;;  %s617_s28 = int_to_ptr.hbm [resolvable:$true] %s616_s28 }
  0x59   : > { %3005 = dma.hbm_to_vmem [thread:$0]  (!%p3989_p12), %s617_s28, 256, %s619_s26, [#allocation4], %s4573_s4, %s4573_s4, %s4572_s30  }
  0x5a   : > { %s642_s24 = sshll.u32 %s4571_s1, 4  ;;  %s644_s19 = sshll.u32 %s3805_s5, 4  ;;  %s643_s24 = int_to_ptr.hbm [resolvable:$true] %s642_s24  ;;  %s645_s19 = int_to_ptr.vmem [resolvable:$true] %s644_s19 }
  0x5b   : > { %3011 = dma.hbm_to_vmem [thread:$0]  (!%p3989_p12), %s643_s24, 1024, %s645_s19, [#allocation7], %s4573_s4, %s4573_s4, %s4572_s30  }
  0x5c   : > { %s670_s22 = sshll.u32 %s4574_s17, 4  ;;  %s672_s0 = sshll.u32 %s3806_s25, 4  ;;  %s671_s22 = int_to_ptr.hbm [resolvable:$true] %s670_s22  ;;  %s673_s0 = int_to_ptr.vmem [resolvable:$true] %s672_s0 }
  0x5d   : > { %s2948_s28 = smul.u32 3, %s4022_s9  ;;  %s778_s5 = scalar_lea.hbm %s4505_s8, %s3789_s3 }
  0x5e   : > { %s2949_s26 = smul.u32 3, %s3789_s3  ;;  %s775_s25 = scalar_lea.vmem [#allocation17], %s4022_s9 }
  0x5f   : > { %3017 = dma.hbm_to_vmem [thread:$0]  (!%p3989_p12), %s671_s22, 256, %s673_s0, [#allocation10], %s4573_s4, %s4573_s4, %s4572_s30  }
  0x60   : > { %s739_s23 = scalar_lea.hbm %s4575_s6, %s2949_s26  ;;  %s735_s24 = scalar_lea.vmem [#allocation14], %s2948_s28 }
  0x61   : > { %s741_s19 = sshll.u32 %s739_s23, 4  ;;  %s743_s27 = sshll.u32 %s735_s24, 4  ;;  %s742_s19 = int_to_ptr.hbm [resolvable:$true] %s741_s19  ;;  %s744_s27 = int_to_ptr.vmem [resolvable:$true] %s743_s27 }
  0x62   : > { %3027 = dma.hbm_to_vmem [thread:$0]  (!%p3998_p0), %s742_s19, 48, %s744_s27, %s710_s29  }
  0x63   : > { %s780_s22 = sshll.u32 %s778_s5, 4  ;;  %s782_s0 = sshll.u32 %s775_s25, 4  ;;  %s781_s22 = int_to_ptr.hbm [resolvable:$true] %s780_s22  ;;  %s783_s0 = int_to_ptr.vmem [resolvable:$true] %s782_s0 }
  0x64   : > { %s4576_s26 = scalar_lea.sflag [#allocation16], %s4014_s2  ;;  %s2573_s28 = sshll.u32 %s4022_s9, 7 }
  0x65   : > { %3033 = dma.hbm_to_vmem [thread:$0]  (!%p3998_p0), %s781_s22, 16, %s783_s0, %s4576_s26  }
  0x66   : > { %s2862_s20 = sshll.u32 %s3789_s3, 7  ;;  %s816_s24 = scalar_lea.vmem [#allocation20], %s2573_s28 }
  0x67   : > { %s821_s23 = scalar_lea.hbm %s4508_s11, %s2862_s20  ;;  %s824_s27 = sshll.u32 %s816_s24, 4  ;;  %s825_s27 = int_to_ptr.vmem [resolvable:$true] %s824_s27 }
  0x68   : > { %s822_s19 = sshll.u32 %s821_s23, 4  ;;  %s4577_s17 = scalar_lea.sflag [#allocation19], %s4014_s2  ;;  %s823_s19 = int_to_ptr.hbm [resolvable:$true] %s822_s19 }
  0x69   : > { %3039 = dma.hbm_to_vmem [thread:$0]  (!%p3998_p0), %s823_s19, 2048, %s825_s27, %s4577_s17, %s4573_s4, %s4573_s4, %s4572_s30  }
  0x6a   : > { %s862_s22 = scalar_lea.hbm %s4510_s13, %s2862_s20  ;;  %s857_s0 = scalar_lea.vmem [#allocation23], %s2573_s28 }
  0x6b   : > { %s863_s25 = sshll.u32 %s862_s22, 4  ;;  %s865_s26 = sshll.u32 %s857_s0, 4  ;;  %s864_s25 = int_to_ptr.hbm [resolvable:$true] %s863_s25  ;;  %s866_s26 = int_to_ptr.vmem [resolvable:$true] %s865_s26 }
  0x6c   : > { %s4578_s29 = smov 4   ;;  %s4579_s1 = smov 64  }
  0x6d   : > { %s4580_s23 = scalar_lea.sflag [#allocation22], %s4014_s2  ;;  %s898_s30 = scalar_lea.hbm %s4512_s15, %s3789_s3 }
  0x6e   : > { %3045 = dma.hbm_to_vmem [thread:$0]  (!%p3998_p0), %s864_s25, 2048, %s866_s26, %s4580_s23, %s4579_s1, %s4579_s1, %s4578_s29  }
  0x6f   : > { %s900_s19 = sshll.u32 %s898_s30, 4  ;;  %s895_s27 = scalar_lea.vmem [#allocation26], %s4022_s9  ;;  %s901_s19 = int_to_ptr.hbm [resolvable:$true] %s900_s19 }
  0x70   : > { %s902_s20 = sshll.u32 %s895_s27, 4  ;;  %s4581_s28 = scalar_lea.sflag [#allocation25], %s4014_s2  ;;  %s903_s20 = int_to_ptr.vmem [resolvable:$true] %s902_s20 }
  0x71   : > { %3051 = dma.hbm_to_vmem [thread:$0]  (!%p3998_p0), %s901_s19, 16, %s903_s20, %s4581_s28  }
  0x72   : > { %s915_s5 = scalar_lea.hbm %s4513_s16, %s3789_s3  ;;  %s912_s22 = scalar_lea.vmem [#allocation27], %s4022_s9 }
  0x73   : > { %s919_s0 = sshll.u32 %s912_s22, 4  ;;  %s917_s6 = sshll.u32 %s915_s5, 4  ;;  %s920_s0 = int_to_ptr.vmem [resolvable:$true] %s919_s0  ;;  %s918_s6 = int_to_ptr.hbm [resolvable:$true] %s917_s6 }
  0x74   : > { %s910_s25 = scalar_lea.sflag [#allocation28], %s4014_s2  ;;  %928 = sbr.rel (%p3978_p10) target bundleno = 2550 (0x9f6), region = 104 }
  0x75   : > { %3054 = dma.hbm_to_vmem [thread:$0]  (!%p3998_p0), %s918_s6, 16, %s920_s0, %s910_s25  }
  0x76   : > { %s4583_s29 = sld [smem:[#allocation46_spill]] (!%p3978_p10) }
  0x79   : > { %3728 = dma.done.wait (%p196_p5), [#allocation4], 256  }
  0x7a   : > { %3730 = vsyncadd (%p196_p5), [#allocation4], 4294967040 }
  0x7b   : > { %3732 = dma.done.wait (%p196_p5), [#allocation7], 1152  }
  0x7c   : > { %3734 = vsyncadd (%p196_p5), [#allocation7], 4294966144 }
  0x7d   : > { %3736 = dma.done.wait (%p196_p5), [#allocation10], 1280  }
  0x7e   : > { %3738 = vsyncadd (%p196_p5), [#allocation10], 4294966016  ;;  %s4584_s6 = sld [smem:[#allocation42_spill]]  ;;  %s4173_s2 = sand.u32 1, %s4583_s29  }
  0x7f   : > { %s956_s23 = scalar_lea.sflag [#allocation13], %s4173_s2 }
  0x84   : > { %s4176_s9 = sand.u32 1, %s4584_s6  }
  0x85   : > { %s2950_s1 = smul.u32 192, %s4176_s9 }
  0x87   : > { %s4180_s24 = scalar_lea.vmem [#allocation12], %s2950_s1 }
  0x88   : > { %3740 = dma.done.wait (%p3970_p8), %s956_s23, 3120  }
  0x89   : > { %3742 = vsyncadd (%p3970_p8), %s956_s23, 4294964176  ;;  %s2951_s4 = smul.u32 3, %s4176_s9  ;;  %s2587_s30 = sshll.u32 %s4176_s9, 6 }
  0x8a   : > { %s976_s27 = scalar_lea.sflag [#allocation16], %s4173_s2  ;;  %s4191_s20 = scalar_lea.vmem [#allocation15], %s2587_s30 }
  0x8b   : > { %s4188_s19 = scalar_lea.vmem [#allocation14], %s2951_s4 }
  0x8c   : > { %3744 = dma.done.wait (%p3970_p8), %s976_s27, 1040  }
  0x8d   : > { %3746 = vsyncadd (%p3970_p8), %s976_s27, 4294966256  ;;  %s988_s28 = scalar_lea.vmem [#allocation17], %s4176_s9  ;;  %s995_s17 = scalar_lea.sflag [#allocation19], %s4173_s2 }
  0x8e   : > { %s997_s18 = scalar_lea.vmem [#allocation18], %s4176_s9 }
  0x8f   : > { %3748 = dma.done.wait (%p3970_p8), %s995_s17, 2064  }
  0x90   : > { %3750 = vsyncadd (%p3970_p8), %s995_s17, 4294965232  ;;  %s2588_s5 = sshll.u32 %s4176_s9, 7  ;;  %s2589_s22 = sshll.u32 %s4176_s9, 1 }
  0x91   : > { %s4206_s0 = scalar_lea.vmem [#allocation20], %s2588_s5  ;;  %s1014_s25 = scalar_lea.sflag [#allocation22], %s4173_s2 }
  0x92   : > { %s4209_s26 = scalar_lea.vmem [#allocation21], %s2589_s22 }
  0x93   : > { %3752 = dma.done.wait (%p3970_p8), %s1014_s25, 2080  }
  0x94   : > { %3754 = vsyncadd (%p3970_p8), %s1014_s25, 4294965216  ;;  %s4215_s6 = scalar_lea.vmem [#allocation23], %s2588_s5  ;;  %s1034_s1 = scalar_lea.sflag [#allocation25], %s4173_s2 }
  0x95   : > { %s1036_s23 = scalar_lea.vmem [#allocation24], %s4176_s9 }
  0x96   : > { %3756 = dma.done.wait (%p3970_p8), %s1034_s1, 32  }
  0x97   : > { %3758 = vsyncadd (%p3970_p8), %s1034_s1, 4294967264  ;;  %s1045_s4 = scalar_lea.vmem [#allocation26], %s4176_s9  ;;  %s1052_s30 = scalar_lea.sflag [#allocation28], %s4173_s2 }
  0x98   : > { %s1054_s27 = scalar_lea.vmem [#allocation27], %s4176_s9 }
  0x99   : > { %3760 = dma.done.wait (%p3970_p8), %s1052_s30, 16  }
  0x9a   : > { %3762 = vsyncadd (%p3970_p8), %s1052_s30, 4294967280 }
  0x9b   : > { %3764 = dma.done.wait (%p196_p5), [#allocation28], 2048  }
  0x9c   : > { %3766 = vsyncadd (%p196_p5), [#allocation28], 4294965248  ;;  %s4586_s17 = sld [smem:[#allocation44_spill]] }
  0x9d   : > { %s4587_s25 = sld [smem:[#allocation58_spill]] }
  0xa2   : > { %p1163_p1 = scmp.lt.s32.totalorder %s4586_s17, 7  ;;  %p2592_p2 = scmp.ne.s32.totalorder %s4586_s17, 0 }
  0xa4   : > { %s4236_s5 = scalar_select %p1163_p1, %s4586_s17, 7 }
  0xa5   : > { %1170 = sbr.rel (%p2592_p2) target bundleno = 304 (0x130), region = 176 }
  0xa6   : > { %s1165_s1 = scalar_lea.vmem %s4587_s25, %s4236_s5 }
  0xaa   : > { %v1174_v0 = vld [vmem:[#allocation11 + $0x8] sm:$0x3f]  ;;  %vm1183_vm0 = vcmask 1045504   ;;  %v1173_v1 = vld [vmem:[#allocation11] sm:$0xff]  ;;  %vm1176_vm1 = vcmask 113664   ;;  %v1172_v3 = vld [vmem:[#allocation3 + $0x8] sm:$0xff] }
  0xab   : > { %2593 = vmatpush.msk.msra.mxu0 %vm1183_vm0, %v1174_v0  ;;  %2928 = vmatpush.msk.msra.mxu1 %vm1183_vm0, %v1174_v0  ;;  %v1171_v2 = vld [vmem:[#allocation3] sm:$0xff]  ;;  %v1175_v4 = vld [vmem:[#allocation6] sm:$0xff] }
  0xad   : > { %1202 = vmatpush.msra.mxu0 %v1173_v1  ;;  %2929 = vmatpush.msra.mxu1 %v1173_v1 }
  0xae   : > { %2594 = vmatmul.msk.f32.vlgmr.msra.gmra.mxu0 %vm1176_vm1, %v1171_v2  ;;  %2595 = vmatmul.msk.f32.vlgmr.msra.gmra.mxu1 %vm1176_vm1, %v1172_v3 }
 0x12b   : > { %v1204_v5 = vpop.f32.mrf.mxu0  ;;  %v1207_v6 = vpop.f32.mrf.mxu1 }
 0x12c   : > { %v1205_v7 = vadd.f32 %v1204_v5, %v1175_v4  ;;  %v1208_v8 = vadd.f32 %v1207_v6, %v1175_v4 }
 0x12e   : > { %1210 = vst [vmem:[#allocation2] sm:$0xff] %v1205_v7 }
 0x12f   : > { %1211 = vst [vmem:[#allocation2 + $0x8] sm:$0xff] %v1208_v8 }
 0x130 PF: > { %v2885_v9 = vld [vmem:[%s4180_s24 + $0xac] sm:$0xf]  ;;  %v2684_v10 = vld [vmem:[%s4180_s24 + $0xb4] sm:$0xf0]  ;;  %v2882_v11 = vld [vmem:[%s4180_s24 + $0x94] sm:$0xf] }
 0x131   : > { %v2687_v12 = vor.u32 %v2885_v9, %v2684_v10  ;;  %v2672_v13 = vld [vmem:[%s4180_s24 + $0x9c] sm:$0xf0]  ;;  %v2879_v15 = vld [vmem:[%s4180_s24 + $0x7c] sm:$0xf]  ;;  %v2660_v16 = vld [vmem:[%s4180_s24 + $0x84] sm:$0xf0] }
 0x132   : > { %v2675_v14 = vor.u32 %v2882_v11, %v2672_v13  ;;  %v2682_v17 = vld [vmem:[%s4180_s24 + $0xa8] sm:$0xf]  ;;  %v2886_v18 = vld [vmem:[%s4180_s24 + $0xb0] sm:$0xf0]  ;;  %v2670_v20 = vld [vmem:[%s4180_s24 + $0x90] sm:$0xf]  ;;  %v2663_v22 = vor.u32 %v2879_v15, %v2660_v16 }
 0x133   : > { %1413 = vmatpush.bf16.msra.mxu1 %v2687_v12  ;;  %v2683_v19 = vor.u32 %v2886_v18, %v2682_v17  ;;  %v2883_v21 = vld [vmem:[%s4180_s24 + $0x98] sm:$0xf0]  ;;  %v2876_v23 = vld [vmem:[%s4180_s24 + $0x64] sm:$0xf]  ;;  %v2648_v24 = vld [vmem:[%s4180_s24 + $0x6c] sm:$0xf0] }
 0x134   : > { %v2671_v25 = vor.u32 %v2883_v21, %v2670_v20  ;;  %v2658_v26 = vld [vmem:[%s4180_s24 + $0x78] sm:$0xf]  ;;  %v2880_v27 = vld [vmem:[%s4180_s24 + $0x80] sm:$0xf0]  ;;  %v2651_v28 = vor.u32 %v2876_v23, %v2648_v24  ;;  %v2873_v29 = vld [vmem:[%s4180_s24 + $0x4c] sm:$0xf] }
 0x135   : > { %1399 = vmatpush.bf16.msra.mxu0 %v2683_v19  ;;  %v2690_v30 = vld [vmem:[%s4180_s24 + $0xb0] sm:$0xf]  ;;  %v2887_v31 = vld [vmem:[%s4180_s24 + $0xb8] sm:$0xf0]  ;;  %v2636_v32 = vld [vmem:[%s4180_s24 + $0x54] sm:$0xf0]  ;;  %v2659_v33 = vor.u32 %v2880_v27, %v2658_v26 }
 0x136   : > { %v2691_v34 = vor.u32 %v2887_v31, %v2690_v30  ;;  %v2678_v35 = vld [vmem:[%s4180_s24 + $0x98] sm:$0xf]  ;;  %v2884_v36 = vld [vmem:[%s4180_s24 + $0xa0] sm:$0xf0]  ;;  %v2646_v37 = vld [vmem:[%s4180_s24 + $0x60] sm:$0xf]  ;;  %v2639_v42 = vor.u32 %v2873_v29, %v2636_v32 }
 0x137   : > { %1414 = vmatpush.bf16.msra.mxu1 %v2675_v14  ;;  %v2877_v38 = vld [vmem:[%s4180_s24 + $0x68] sm:$0xf0]  ;;  %v2870_v39 = vld [vmem:[%s4180_s24 + $0x34] sm:$0xf]  ;;  %v2679_v40 = vor.u32 %v2884_v36, %v2678_v35  ;;  %v2666_v41 = vld [vmem:[%s4180_s24 + $0x80] sm:$0xf] }
 0x138   : > { %1427 = vmatpush.bf16.msra.mxu2 %v2691_v34  ;;  %v2881_v43 = vld [vmem:[%s4180_s24 + $0x88] sm:$0xf0]  ;;  %v2624_v44 = vld [vmem:[%s4180_s24 + $0x3c] sm:$0xf0]  ;;  %v2647_v45 = vor.u32 %v2877_v38, %v2646_v37  ;;  %v2634_v46 = vld [vmem:[%s4180_s24 + $0x48] sm:$0xf] }
 0x139   : > { %1400 = vmatpush.bf16.msra.mxu0 %v2671_v25  ;;  %v2874_v47 = vld [vmem:[%s4180_s24 + $0x50] sm:$0xf0]  ;;  %v2667_v48 = vor.u32 %v2881_v43, %v2666_v41  ;;  %v2627_v49 = vor.u32 %v2870_v39, %v2624_v44  ;;  %v2654_v50 = vld [vmem:[%s4180_s24 + $0x68] sm:$0xf]  ;;  %v2867_v52 = vld [vmem:[%s4180_s24 + $0x1c] sm:$0xf] }
 0x13a   : > { %v2878_v51 = vld [vmem:[%s4180_s24 + $0x70] sm:$0xf0]  ;;  %v2612_v53 = vld [vmem:[%s4180_s24 + $0x24] sm:$0xf0]  ;;  %v2635_v54 = vor.u32 %v2874_v47, %v2634_v46  ;;  %v2622_v55 = vld [vmem:[%s4180_s24 + $0x30] sm:$0xf] }
 0x13b   : > { %1415 = vmatpush.bf16.msra.mxu1 %v2663_v22  ;;  %v2871_v56 = vld [vmem:[%s4180_s24 + $0x38] sm:$0xf0]  ;;  %v2655_v57 = vor.u32 %v2878_v51, %v2654_v50  ;;  %v2615_v58 = vor.u32 %v2867_v52, %v2612_v53  ;;  %v2864_v59 = vld [vmem:[%s4180_s24 + $0x4] sm:$0xf]  ;;  %v2600_v60 = vld [vmem:[%s4180_s24 + $0xc] sm:$0xf0] }
 0x13c   : > { %1428 = vmatpush.bf16.msra.mxu2 %v2679_v40  ;;  %v2623_v61 = vor.u32 %v2871_v56, %v2622_v55  ;;  %v2610_v62 = vld [vmem:[%s4180_s24 + $0x18] sm:$0xf]  ;;  %v2868_v63 = vld [vmem:[%s4180_s24 + $0x20] sm:$0xf0]  ;;  %v2603_v0 = vor.u32 %v2864_v59, %v2600_v60  ;;  %v4281_v1 = vld [vmem:[#allocation2] sm:$0xff]  ;;  %vm1477_vm2 = vcmask 523264  }
 0x13d   : > { %1401 = vmatpush.bf16.msra.mxu0 %v2659_v33  ;;  %v4283_v2 = vld [vmem:[#allocation2 + $0x8] sm:$0xff]  ;;  %v2611_v3 = vor.u32 %v2868_v63, %v2610_v62  ;;  %v2598_v4 = vld [vmem:[%s4180_s24] sm:$0xf]  ;;  %v2865_v5 = vld [vmem:[%s4180_s24 + $0x8] sm:$0xf0] }
 0x13e   : > { %v1230_v6 = vpack.c.bf16 %v4283_v2, %v4281_v1  ;;  %v2599_v7 = vor.u32 %v2865_v5, %v2598_v4  ;;  %v2642_v8 = vld [vmem:[%s4180_s24 + $0x50] sm:$0xf]  ;;  %v2875_v9 = vld [vmem:[%s4180_s24 + $0x58] sm:$0xf0]  ;;  %v2630_v11 = vld [vmem:[%s4180_s24 + $0x38] sm:$0xf] }
 0x13f   : > { %1416 = vmatpush.bf16.msra.mxu1 %v2651_v28  ;;  %v2643_v10 = vor.u32 %v2875_v9, %v2642_v8  ;;  %v2872_v12 = vld [vmem:[%s4180_s24 + $0x40] sm:$0xf0]  ;;  %v2618_v14 = vld [vmem:[%s4180_s24 + $0x20] sm:$0xf]  ;;  %v2869_v15 = vld [vmem:[%s4180_s24 + $0x28] sm:$0xf0] }
 0x140   : > { %1429 = vmatpush.bf16.msra.mxu2 %v2667_v48  ;;  %v2631_v13 = vor.u32 %v2872_v12, %v2630_v11  ;;  %v2619_v16 = vor.u32 %v2869_v15, %v2618_v14  ;;  %v2606_v17 = vld [vmem:[%s4180_s24 + $0x8] sm:$0xf]  ;;  %v2866_v18 = vld [vmem:[%s4180_s24 + $0x10] sm:$0xf0]  ;;  %v4298_v20 = vld [vmem:[%s4188_s19] sm:$0x7] }
 0x141   : > { %1402 = vmatpush.bf16.msra.mxu0 %v2647_v45  ;;  %v2607_v19 = vor.u32 %v2866_v18, %v2606_v17  ;;  %v1266_v21 = vperm.slane %v4298_v20, 1  ;;  %v4301_v23 = vld [vmem:[#allocation8 + $0x38] sm:$0xff]  ;;  %v4304_v26 = vld [vmem:[#allocation8 + $0x30] sm:$0xff]  ;;  %v4307_v29 = vld [vmem:[#allocation8 + $0x28] sm:$0xff]  ;;  %v1265_v45 = vperm.slane %v4298_v20, 0  ;;  %s4589_s19 = sld [smem:[#allocation44_spill]] }
 0x142   : > { %v4311_v33 = vld [vmem:[#allocation8 + $0x20] sm:$0xff]  ;;  %v4315_v36 = vld [vmem:[#allocation8 + $0x18] sm:$0xff]  ;;  %v4319_v39 = vld [vmem:[#allocation8 + $0x10] sm:$0xff] }
 0x143   : > { %1417 = vmatpush.bf16.msra.mxu1 %v2639_v42  ;;  %v4323_v42 = vld [vmem:[#allocation8 + $0x8] sm:$0xff]  ;;  %v4328_v46 = vld [vmem:[#allocation8] sm:$0xff]  ;;  %v1229_v55 = vld [vmem:[#allocation9 + $0x38] sm:$0xff] }
 0x144   : > { %1430 = vmatpush.bf16.msra.mxu2 %v2655_v57  ;;  %v1228_v56 = vld [vmem:[#allocation9 + $0x30] sm:$0xff]  ;;  %v1227_v57 = vld [vmem:[#allocation9 + $0x28] sm:$0xff]  ;;  %v1225_v59 = vld [vmem:[#allocation9 + $0x18] sm:$0xff] }
 0x145   : > { %1403 = vmatpush.bf16.msra.mxu0 %v2635_v54  ;;  %v1224_v60 = vld [vmem:[#allocation9 + $0x10] sm:$0xff]  ;;  %v1223_v62 = vld [vmem:[#allocation9 + $0x8] sm:$0xff]  ;;  %v1222_v63 = vld [vmem:[#allocation9] sm:$0xff] }
 0x147   : > { %1418 = vmatpush.bf16.msra.mxu1 %v2627_v49  ;;  %p2856_p3 = scmp.ne.s32.totalorder %s4589_s19, 7 }
 0x148   : > { %1431 = vmatpush.bf16.msra.mxu2 %v2643_v10 }
 0x149   : > { %1404 = vmatpush.bf16.msra.mxu0 %v2623_v61 }
 0x14b   : > { %1419 = vmatpush.bf16.msra.mxu1 %v2615_v58  ;;  %v1226_v58 = vld [vmem:[#allocation9 + $0x20] sm:$0xff] }
 0x14c   : > { %1432 = vmatpush.bf16.msra.mxu2 %v2631_v13 }
 0x14d   : > { %1405 = vmatpush.bf16.msra.mxu0 %v2611_v3 }
 0x14f   : > { %1420 = vmatpush.bf16.msra.mxu1 %v2603_v0 }
 0x150   : > { %1433 = vmatpush.bf16.msra.mxu2 %v2619_v16 }
 0x151   : > { %1406 = vmatpush.bf16.msra.mxu0 %v2599_v7  ;;  %v1267_v7 = vperm.slane %v4298_v20, 2 }
 0x152   : > { %1421 = vmatmul.bf16.vlgmr.msra.gmra.mxu1 %v1230_v6 }
 0x154   : > { %1407 = vmatmul.bf16.vlgmr.msra.gmra.mxu0 %v1230_v6  ;;  %1434 = vmatpush.bf16.msra.mxu2 %v2607_v19 }
 0x155   : > { %1495 = vmatpush.msrb.mxu0 %v1229_v55 }
 0x157   : > { %1435 = vmatmul.bf16.vlgmr.msra.gmra.mxu2 %v1230_v6  ;;  %1496 = vmatpush.msrb.mxu0 %v1228_v56 }
 0x159   : > { %1497 = vmatpush.msrb.mxu0 %v1227_v57 }
 0x15b   : > { %1498 = vmatpush.msrb.mxu0 %v1226_v58 }
 0x15d   : > { %1499 = vmatpush.msrb.mxu0 %v1225_v59 }
 0x15f   : > { %1500 = vmatpush.msrb.mxu0 %v1224_v60 }
 0x161   : > { %1501 = vmatpush.msrb.mxu0 %v1223_v62 }
 0x163   : > { %1502 = vmatpush.msrb.mxu0 %v1222_v63 }
 0x1cf   : > { %v1422_v22 = vpop.f32.mrf.mxu1 }
 0x1d0   : > { %v1423_v24 = vadd.f32 %v1422_v22, %v1266_v21 }
 0x1d1   : > { %v1408_v47 = vpop.f32.mrf.mxu0 }
 0x1d2   : > { %v1448_v25 = vmul.f32 %v1423_v24, %v4301_v23  ;;  %v1447_v27 = vmul.f32 %v1423_v24, %v4304_v26  ;;  %v1446_v31 = vmul.f32 %v1423_v24, %v4307_v29  ;;  %v1445_v34 = vmul.f32 %v1423_v24, %v4311_v33 }
 0x1d3   : > { %v1444_v37 = vmul.f32 %v1423_v24, %v4315_v36  ;;  %v1443_v40 = vmul.f32 %v1423_v24, %v4319_v39  ;;  %v1442_v43 = vmul.f32 %v1423_v24, %v4323_v42  ;;  %v1441_v48 = vmul.f32 %v1423_v24, %v4328_v46 }
 0x1d4   : > { %1465 = vmatpush.xpose.msra.mxu3 %v1448_v25  ;;  %v1409_v50 = vadd.f32 %v1408_v47, %v1265_v45 }
 0x1d7   : > { %v1424_v28 = vpop.f32.mrf.mxu1 }
 0x1d8   : > { %v1425_v30 = vadd.f32 %v1424_v28, %v1266_v21  ;;  %1466 = vmatpush.xpose.msra.mxu3 %v1447_v27 }
 0x1d9   : > { %v1410_v52 = vpop.f32.mrf.mxu0 }
 0x1da   : > { %v1539_v32 = vmul.f32 %v1425_v30, %v4301_v23  ;;  %v1538_v35 = vmul.f32 %v1425_v30, %v4304_v26  ;;  %v1537_v38 = vmul.f32 %v1425_v30, %v4307_v29  ;;  %v1536_v41 = vmul.f32 %v1425_v30, %v4311_v33  ;;  %v1436_v61 = vpop.f32.mrf.mxu2 }
 0x1db   : > { %v1535_v44 = vmul.f32 %v1425_v30, %v4315_v36  ;;  %v1534_v49 = vmul.f32 %v1425_v30, %v4319_v39  ;;  %v1533_v51 = vmul.f32 %v1425_v30, %v4323_v42  ;;  %v1532_v53 = vmul.f32 %v1425_v30, %v4328_v46 }
 0x1dc   : > { %1467 = vmatpush.xpose.msra.mxu3 %v1446_v31  ;;  %1556 = vmatpush.xpose.msrb.mxu2 %v1539_v32  ;;  %v1411_v54 = vadd.f32 %v1410_v52, %v1265_v45  ;;  %v1437_v8 = vadd.f32 %v1436_v61, %v1267_v7  ;;  %v2889_v45 = vld [vmem:[%s4191_s20 + $0x8] sm:$0xff] }
 0x1de   : > { %v1456_v10 = vmul.f32 %v1437_v8, %v4301_v23  ;;  %v1455_v12 = vmul.f32 %v1437_v8, %v4304_v26  ;;  %v1454_v14 = vmul.f32 %v1437_v8, %v4307_v29  ;;  %v1453_v16 = vmul.f32 %v1437_v8, %v4311_v33 }
 0x1df   : > { %v1452_v18 = vmul.f32 %v1437_v8, %v4315_v36  ;;  %v1451_v20 = vmul.f32 %v1437_v8, %v4319_v39  ;;  %v1450_v22 = vmul.f32 %v1437_v8, %v4323_v42  ;;  %v1449_v24 = vmul.f32 %v1437_v8, %v4328_v46 }
 0x1e0   : > { %1468 = vmatpush.xpose.msra.mxu3 %v1445_v34  ;;  %1557 = vmatpush.xpose.msrb.mxu2 %v1538_v35 }
 0x1e2   : > { %v1438_v0 = vpop.f32.mrf.mxu2 }
 0x1e3   : > { %v1439_v9 = vadd.f32 %v1438_v0, %v1267_v7 }
 0x1e4   : > { %1469 = vmatpush.xpose.msra.mxu3 %v1444_v37  ;;  %1558 = vmatpush.xpose.msrb.mxu2 %v1537_v38  ;;  %v2895_v37 = vld [vmem:[%s4191_s20 + $0x38] sm:$0xff]  ;;  %v2894_v38 = vld [vmem:[%s4191_s20 + $0x30] sm:$0xff] }
 0x1e5   : > { %v1547_v11 = vmul.f32 %v1439_v9, %v4301_v23  ;;  %v1546_v13 = vmul.f32 %v1439_v9, %v4304_v26  ;;  %v1545_v15 = vmul.f32 %v1439_v9, %v4307_v29  ;;  %v1544_v17 = vmul.f32 %v1439_v9, %v4311_v33  ;;  %1691 = vmatpush.bf16.msrb.mxu1 %v2895_v37  ;;  %v2756_v37 = vld [vmem:[%s4206_s0 + $0x38] sm:$0xf0] }
 0x1e6   : > { %v1543_v19 = vmul.f32 %v1439_v9, %v4315_v36  ;;  %v1542_v21 = vmul.f32 %v1439_v9, %v4319_v39  ;;  %v1541_v23 = vmul.f32 %v1439_v9, %v4323_v42  ;;  %v1540_v25 = vmul.f32 %v1439_v9, %v4328_v46  ;;  %v2893_v39 = vld [vmem:[%s4191_s20 + $0x28] sm:$0xff]  ;;  %v2891_v42 = vld [vmem:[%s4191_s20 + $0x18] sm:$0xff]  ;;  %v2786_v9 = vld [vmem:[%s4206_s0 + $0x70] sm:$0xf] }
 0x1e7   : > { %1610 = vmatpush.msra.mxu0 %v1547_v11  ;;  %v2910_v11 = vld [vmem:[%s4206_s0 + $0x74] sm:$0xf] }
 0x1e8   : > { %1470 = vmatpush.xpose.msra.mxu3 %v1443_v40  ;;  %1559 = vmatpush.xpose.msrb.mxu2 %v1536_v41  ;;  %v2892_v40 = vld [vmem:[%s4191_s20 + $0x20] sm:$0xff] }
 0x1e9   : > { %1611 = vmatpush.msra.mxu0 %v1546_v13  ;;  %1692 = vmatpush.bf16.msrb.mxu1 %v2894_v38  ;;  %v2788_v13 = vld [vmem:[%s4206_s0 + $0x78] sm:$0xf0] }
 0x1eb   : > { %1612 = vmatpush.msra.mxu0 %v1545_v15  ;;  %v2778_v15 = vld [vmem:[%s4206_s0 + $0x60] sm:$0xf] }
 0x1ec   : > { %1471 = vmatpush.xpose.msra.mxu3 %v1442_v43  ;;  %1560 = vmatpush.xpose.msrb.mxu2 %v1535_v44  ;;  %v2890_v43 = vld [vmem:[%s4191_s20 + $0x10] sm:$0xff] }
 0x1ed   : > { %1613 = vmatpush.msra.mxu0 %v1544_v17  ;;  %1693 = vmatpush.bf16.msrb.mxu1 %v2893_v39  ;;  %v2908_v17 = vld [vmem:[%s4206_s0 + $0x64] sm:$0xf]  ;;  %v2746_v39 = vld [vmem:[%s4206_s0 + $0x20] sm:$0xf] }
 0x1ef   : > { %1614 = vmatpush.msra.mxu0 %v1543_v19  ;;  %v2780_v19 = vld [vmem:[%s4206_s0 + $0x68] sm:$0xf0] }
 0x1f0   : > { %1472 = vmatpush.xpose.msra.mxu3 %v1441_v48  ;;  %1561 = vmatpush.xpose.msrb.mxu2 %v1534_v49  ;;  %v2888_v48 = vld [vmem:[%s4191_s20] sm:$0xff] }
 0x1f1   : > { %1615 = vmatpush.msra.mxu0 %v1542_v21  ;;  %1694 = vmatpush.bf16.msrb.mxu1 %v2892_v40  ;;  %v2770_v21 = vld [vmem:[%s4206_s0 + $0x50] sm:$0xf]  ;;  %v2901_v40 = vld [vmem:[%s4206_s0 + $0x24] sm:$0xf0] }
 0x1f3   : > { %1473 = vmatmul.f32.vlgmr.msra.gmra.mxu3 %v1409_v50  ;;  %1616 = vmatpush.msra.mxu0 %v1541_v23  ;;  %v2906_v23 = vld [vmem:[%s4206_s0 + $0x54] sm:$0xf] }
 0x1f4   : > { %1562 = vmatpush.xpose.msrb.mxu2 %v1533_v51  ;;  %1520 = vmatpush.msrb.mxu3 %v1456_v10  ;;  %v3134_v51 = vld [vmem:[%s988_s28] ss:$0 sm:$0xff]  ;;  %v2911_v10 = vld [vmem:[%s4206_s0 + $0x74] sm:$0xf0]  ;;  %s4590_s28 = sld [smem:[#allocation59_spill]] (!%p2856_p3) }
 0x1f5   : > { %1617 = vmatpush.msra.mxu0 %v1540_v25  ;;  %1695 = vmatpush.bf16.msrb.mxu1 %v2891_v42  ;;  %v2772_v25 = vld [vmem:[%s4206_s0 + $0x58] sm:$0xf0]  ;;  %v2747_v42 = vor.u32 %v2901_v40, %v2746_v39  ;;  %v1783_v39 = vld [vmem:[%s4209_s26] sm:$0x3]  ;;  %s4591_s26 = sld [smem:[#allocation60_spill]] (!%p2856_p3) }
 0x1f6   : > { %1521 = vmatpush.msrb.mxu3 %v1455_v12  ;;  %v2787_v12 = vor.u32 %v2911_v10, %v2786_v9  ;;  %v2917_v9 = vld [vmem:[%s4215_s6 + $0x28] sm:$0xff] }
 0x1f8   : > { %1563 = vmatpush.xpose.msrb.mxu2 %v1532_v53  ;;  %1522 = vmatpush.msrb.mxu3 %v1454_v14  ;;  %v2791_v14 = vor.u32 %v2910_v11, %v2788_v13 }
 0x1f9   : > { %1696 = vmatpush.bf16.msrb.mxu1 %v2890_v43  ;;  %v2748_v43 = vld [vmem:[%s4206_s0 + $0x28] sm:$0xf0] }
 0x1fa   : > { %1523 = vmatpush.msrb.mxu3 %v1453_v16  ;;  %v2909_v16 = vld [vmem:[%s4206_s0 + $0x64] sm:$0xf0] }
 0x1fb   : > { %1564 = vmatmul.f32.vlgmr.msrb.gmra.mxu2 %v1411_v54 }
 0x1fc   : > { %1524 = vmatpush.msrb.mxu3 %v1452_v18  ;;  %v2779_v18 = vor.u32 %v2909_v16, %v2778_v15 }
 0x1fd   : > { %1697 = vmatpush.bf16.msrb.mxu1 %v2889_v45  ;;  %v2738_v45 = vld [vmem:[%s4206_s0 + $0x10] sm:$0xf] }
 0x1fe   : > { %1525 = vmatpush.msrb.mxu3 %v1451_v20  ;;  %v2783_v20 = vor.u32 %v2908_v17, %v2780_v19 }
 0x200   : > { %1526 = vmatpush.msrb.mxu3 %v1450_v22  ;;  %v2907_v22 = vld [vmem:[%s4206_s0 + $0x54] sm:$0xf0] }
 0x201   : > { %1698 = vmatpush.bf16.msrb.mxu1 %v2888_v48 }
 0x202   : > { %1527 = vmatpush.msrb.mxu3 %v1449_v24  ;;  %v2771_v24 = vor.u32 %v2907_v22, %v2770_v21  ;;  %v3135_v22 = vld [vmem:[%s1165_s1] ss:$0 sm:$0xff] }
 0x204   : > { %1585 = vmatpush.msra.mxu3 %v1229_v55 }
 0x206   : > { %1586 = vmatpush.msra.mxu3 %v1228_v56 }
 0x208   : > { %1587 = vmatpush.msra.mxu3 %v1227_v57 }
 0x20a   : > { %1588 = vmatpush.msra.mxu3 %v1226_v58  ;;  %v3807_v58 = vmov 128.0  }
 0x20c   : > { %1589 = vmatpush.msra.mxu3 %v1225_v59 }
 0x20e   : > { %1590 = vmatpush.msra.mxu3 %v1224_v60 }
 0x210   : > { %1591 = vmatpush.msra.mxu3 %v1223_v62 }
 0x212   : > { %1592 = vmatpush.msra.mxu3 %v1222_v63 }
 0x276   : > { %v1474_v3 = vpop.f32.mrf.mxu3 }
 0x277   : > { %v1478_v4 = vsel %vm1477_vm2, %v1474_v3, -inf }
 0x278   : > { %1479 = vmax.xlane.f32.xlu0 %v1478_v4 }
 0x27e   : > { %v1565_v5 = vpop.f32.mrf.mxu2 }
 0x27f   : > { %v1568_v6 = vsel %vm1477_vm2, %v1565_v5, -inf }
 0x280   : > { %1569 = vmax.xlane.f32.xlu0 %v1568_v6 }
 0x2eb   : > { %v1480_v26 = vpop.xlane.xlu0 %1479 }
 0x2ec   : > { %v1481_v27 = vsub.f32 %v1474_v3, %v1480_v26  ;;  %v2775_v26 = vor.u32 %v2906_v23, %v2772_v25 }
 0x2ee   : > { %v1482_v28 = vmul.f32 1.442695, %v1481_v27  ;;  %v2762_v27 = vld [vmem:[%s4206_s0 + $0x40] sm:$0xf] }
 0x2f0   : > { %3140 = vpow2.f32 %v1482_v28  ;;  %v2905_v28 = vld [vmem:[%s4206_s0 + $0x44] sm:$0xf0] }
 0x2f3   : > { %v1570_v30 = vpop.xlane.xlu0 %1569 }
 0x2f4   : > { %v1571_v32 = vsub.f32 %v1565_v5, %v1570_v30  ;;  %v2763_v30 = vor.u32 %v2905_v28, %v2762_v27  ;;  %v3136_v27 = vld [vmem:[%s997_s18] ss:$0 sm:$0xff] }
 0x2f6   : > { %v3141_v29 = vpop.eup %3140  ;;  %v1572_v34 = vmul.f32 1.442695, %v1571_v32 }
 0x2f7   : > { %2692 = vmatmul.msk.f32.vlgmr.msrb.gmra.mxu0 %vm1477_vm2, %v3141_v29 }
 0x2f8   : > { %1883 = vmatpush.bf16.msrb.mxu0 %v2791_v14 }
 0x2fc   : > { %1884 = vmatpush.bf16.msrb.mxu0 %v2783_v20 }
 0x300   : > { %1885 = vmatpush.bf16.msrb.mxu0 %v2775_v26 }
 0x374   : > { %v1504_v31 = vpop.f32.mrf.mxu0 }
 0x375   : > { %3142 = vrcp.f32 %v1504_v31  ;;  %v2764_v31 = vld [vmem:[%s4206_s0 + $0x48] sm:$0xf0] }
 0x376   : > { %3144 = vpow2.f32 %v1572_v34  ;;  %v2903_v34 = vld [vmem:[%s4206_s0 + $0x34] sm:$0xf0] }
 0x37b   : > { %v3143_v33 = vpop.eup %3142 }
 0x37c   : > { %v1508_v35 = vmul.f32 %v3143_v33, %v3141_v29  ;;  %v3145_v36 = vpop.eup %3144  ;;  %v2904_v29 = vld [vmem:[%s4206_s0 + $0x44] sm:$0xf]  ;;  %v2754_v33 = vld [vmem:[%s4206_s0 + $0x30] sm:$0xf] }
 0x37d   : > { %v2767_v32 = vor.u32 %v2904_v29, %v2764_v31  ;;  %v2923_v31 = vld [vmem:[%s4215_s6 + $0x58] sm:$0xff] }
 0x37e   : > { %2693 = vmatmul.msk.f32.vlgmr.msrb.gmra.mxu3 %vm1477_vm2, %v1508_v35  ;;  %v2902_v35 = vld [vmem:[%s4206_s0 + $0x34] sm:$0xf] }
 0x37f   : > { %1869 = vmatpush.bf16.msrb.mxu3 %v2787_v12  ;;  %1886 = vmatpush.bf16.msrb.mxu0 %v2767_v32  ;;  %v2759_v38 = vor.u32 %v2902_v35, %v2756_v37  ;;  %v2924_v12 = vld [vmem:[%s4215_s6 + $0x60] sm:$0xff]  ;;  %v2914_v35 = vld [vmem:[%s4215_s6 + $0x10] sm:$0xff]  ;;  %v2913_v37 = vld [vmem:[%s4215_s6 + $0x8] sm:$0xff] }
 0x380   : > { %v2916_v32 = vld [vmem:[%s4215_s6 + $0x20] sm:$0xff] }
 0x383   : > { %1870 = vmatpush.bf16.msrb.mxu3 %v2779_v18  ;;  %1887 = vmatpush.bf16.msrb.mxu0 %v2759_v38  ;;  %v2912_v38 = vld [vmem:[%s4215_s6] sm:$0xff] }
 0x386   : > { %2694 = vmatmul.msk.f32.vlgmr.msra.gmra.mxu3 %vm1477_vm2, %v3145_v36 }
 0x387   : > { %1871 = vmatpush.bf16.msrb.mxu3 %v2771_v24 }
 0x38b   : > { %1872 = vmatpush.bf16.msrb.mxu3 %v2763_v30 }
 0x401   : > { %v1529_v41 = vpop.f32.mrf.mxu3 }
 0x409   : > { %v1594_v44 = vpop.f32.mrf.mxu3 }
 0x40a   : > { %3146 = vrcp.f32 %v1594_v44 }
 0x40b   : > { %3148 = vrcp.f32 %v3807_v58 }
 0x410   : > { %v3147_v46 = vpop.eup %3146 }
 0x411   : > { %v1598_v47 = vmul.f32 %v3147_v46, %v3145_v36  ;;  %v3149_v59 = vpop.eup %3148  ;;  %v2755_v36 = vor.u32 %v2903_v34, %v2754_v33  ;;  %v2899_v46 = vld [vmem:[%s4206_s0 + $0x14] sm:$0xf0]  ;;  %v2915_v33 = vld [vmem:[%s4215_s6 + $0x18] sm:$0xff]  ;;  %v2921_v34 = vld [vmem:[%s4215_s6 + $0x48] sm:$0xff] }
 0x412   : > { %v1714_v60 = vmul.f32 128.0, %v3149_v59  ;;  %vm1718_vm3 = vweird.f32 %v3149_v59  ;;  %v2739_v48 = vor.u32 %v2899_v46, %v2738_v45  ;;  %v1785_v45 = vperm.slane %v1783_v39, 0 }
 0x413   : > { %2695 = vmatmul.msk.f32.vlgmr.msra.gmra.mxu0 %vm1477_vm2, %v1598_v47  ;;  %1873 = vmatpush.bf16.msrb.mxu3 %v2755_v36  ;;  %v2898_v47 = vld [vmem:[%s4206_s0 + $0x14] sm:$0xf]  ;;  %v2920_v36 = vld [vmem:[%s4215_s6 + $0x40] sm:$0xff] }
 0x414   : > { %v1715_v61 = vsub.f32 1.0, %v1714_v60  ;;  %v2927_v60 = vld [vmem:[%s4215_s6 + $0x78] sm:$0xff] }
 0x415   : > { %2049 = vmatpush.bf16.msra.mxu1 %v2927_v60 }
 0x416   : > { %v1716_v62 = vmul.f32 %v3149_v59, %v1715_v61  ;;  %v2919_v61 = vld [vmem:[%s4215_s6 + $0x38] sm:$0xff] }
 0x417   : > { %1874 = vmatpush.bf16.msrb.mxu3 %v2747_v42  ;;  %2035 = vmatpush.bf16.msra.mxu2 %v2919_v61 }
 0x418   : > { %v1717_v63 = vadd.f32 %v3149_v59, %v1716_v62 }
 0x41a   : > { %v4369_v0 = vsel %vm1718_vm3, %v3149_v59, %v1717_v63 }
 0x41b   : > { %1875 = vmatpush.bf16.msrb.mxu3 %v2739_v48 }
 0x490   : > { %v1619_v49 = vpop.f32.mrf.mxu0 }
 0x491   : > { %v1622_v50 = vpack.c.bf16 %v1619_v49, %v1529_v41  ;;  %v2900_v41 = vld [vmem:[%s4206_s0 + $0x24] sm:$0xf]  ;;  %v2740_v49 = vld [vmem:[%s4206_s0 + $0x18] sm:$0xf0] }
 0x492   : > { %v2751_v44 = vor.u32 %v2900_v41, %v2748_v43  ;;  %v1786_v41 = vperm.slane %v1783_v39, 1 }
 0x493   : > { %1699 = vmatmul.bf16.vlgmr.msrb.gmra.mxu1 %v1622_v50  ;;  %v2730_v50 = vld [vmem:[%s4206_s0] sm:$0xf] }
 0x494   : > { %1888 = vmatpush.bf16.msrb.mxu0 %v2751_v44 }
 0x510   : > { %v1700_v52 = vpop.f32.mrf.mxu1 }
 0x511   : > { %v1701_v53 = vadd.f32 %v3134_v51, %v1700_v52 }
 0x513   : > { %v1705_v54 = vadd.f32 %v1701_v53, %v4281_v1  ;;  %v2743_v53 = vor.u32 %v2898_v47, %v2740_v49 }
 0x515   : > { %1709 = vadd.xlane.f32.xlu1 %v1705_v54  ;;  %1889 = vmatpush.bf16.msrb.mxu0 %v2743_v53 }
 0x518   : > { %v1702_v55 = vpop.f32.mrf.mxu1 }
 0x519   : > { %v1703_v56 = vadd.f32 %v3134_v51, %v1702_v55  ;;  %v2897_v51 = vld [vmem:[%s4206_s0 + $0x4] sm:$0xf0]  ;;  %v2732_v55 = vld [vmem:[%s4206_s0 + $0x8] sm:$0xf0] }
 0x51b   : > { %v1706_v57 = vadd.f32 %v1703_v56, %v4283_v2 }
 0x51d   : > { %1711 = vadd.xlane.f32.xlu1 %v1706_v57 }
 0x588   : > { %v1710_v1 = vpop.xlane.xlu1 %1709 }
 0x589   : > { %v1720_v3 = vmul.f32 %v4369_v0, %v1710_v1  ;;  %v2926_v1 = vld [vmem:[%s4215_s6 + $0x70] sm:$0xff] }
 0x58a   : > { %2050 = vmatpush.bf16.msra.mxu1 %v2926_v1 }
 0x58b   : > { %v4372_v4 = vsub.f32 %v1705_v54, %v1720_v3  ;;  %v2896_v54 = vld [vmem:[%s4206_s0 + $0x4] sm:$0xf]  ;;  %v2918_v3 = vld [vmem:[%s4215_s6 + $0x30] sm:$0xff] }
 0x58c   : > { %v2735_v58 = vor.u32 %v2896_v54, %v2732_v55  ;;  %2036 = vmatpush.bf16.msra.mxu2 %v2918_v3 }
 0x58d   : > { %v1724_v2 = vmul.f32 %v4372_v4, %v4372_v4 }
 0x58e   : > { %1890 = vmatpush.bf16.msrb.mxu0 %v2735_v58 }
 0x58f   : > { %1726 = vadd.xlane.f32.xlu2 %v1724_v2 }
 0x590   : > { %v1712_v5 = vpop.xlane.xlu1 %1711  ;;  %2037 = vmatpush.bf16.msra.mxu2 %v2917_v9 }
 0x591   : > { %v1721_v6 = vmul.f32 %v4369_v0, %v1712_v5 }
 0x593   : > { %v4377_v7 = vsub.f32 %v1706_v57, %v1721_v6  ;;  %v2731_v57 = vor.u32 %v2897_v51, %v2730_v50 }
 0x594   : > { %2038 = vmatpush.bf16.msra.mxu2 %v2916_v32 }
 0x595   : > { %v1725_v8 = vmul.f32 %v4377_v7, %v4377_v7  ;;  %1876 = vmatpush.bf16.msrb.mxu3 %v2731_v57 }
 0x597   : > { %1728 = vadd.xlane.f32.xlu2 %v1725_v8  ;;  %v2925_v8 = vld [vmem:[%s4215_s6 + $0x68] sm:$0xff] }
 0x598   : > { %2051 = vmatpush.bf16.msra.mxu1 %v2925_v8  ;;  %2039 = vmatpush.bf16.msra.mxu2 %v2915_v33 }
 0x59c   : > { %2052 = vmatpush.bf16.msra.mxu1 %v2924_v12  ;;  %2040 = vmatpush.bf16.msra.mxu2 %v2914_v35 }
 0x5a0   : > { %2053 = vmatpush.bf16.msra.mxu1 %v2923_v31  ;;  %2041 = vmatpush.bf16.msra.mxu2 %v2913_v37 }
 0x5a4   : > { %2042 = vmatpush.bf16.msra.mxu2 %v2912_v38 }
 0x602   : > { %v1727_v52 = vpop.xlane.xlu2 %1726 }
 0x603   : > { %v1730_v56 = vmul.f32 %v1727_v52, %v4369_v0 }
 0x605   : > { %v1732_v59 = vadd.f32 1e-05, %v1730_v56  ;;  %v3137_v56 = vld [vmem:[%s1036_s23] ss:$0 sm:$0xff] }
 0x607   : > { %3150 = vrsqrt.f32 %v1732_v59  ;;  %vm1740_vm5 = vweird.f32 %v1732_v59 }
 0x60a   : > { %v1729_v62 = vpop.xlane.xlu2 %1728 }
 0x60b   : > { %v1731_v63 = vmul.f32 %v1729_v62, %v4369_v0 }
 0x60d   : > { %v3151_v2 = vpop.eup %3150  ;;  %v1733_v5 = vadd.f32 1e-05, %v1731_v63 }
 0x60e   : > { %v1735_v6 = vmul.f32 %v3151_v2, %v1732_v59  ;;  %vm1741_vm4 = vweird.f32 %v3151_v2 }
 0x60f   : > { %3152 = vrsqrt.f32 %v1733_v5  ;;  %vm1742_vm6 = vmor %vm1740_vm5, %vm1741_vm4  ;;  %vm1750_vm8 = vweird.f32 %v1733_v5 }
 0x610   : > { %v1736_v10 = vmul.f32 %v3151_v2, %v1735_v6 }
 0x612   : > { %v1737_v11 = vmul.f32 0.5, %v1736_v10 }
 0x614   : > { %v1738_v13 = vsub.f32 1.5, %v1737_v11 }
 0x615   : > { %v3153_v14 = vpop.eup %3152 }
 0x616   : > { %v1739_v15 = vmul.f32 %v3151_v2, %v1738_v13  ;;  %v1745_v16 = vmul.f32 %v3153_v14, %v1733_v5  ;;  %vm1751_vm7 = vweird.f32 %v3153_v14 }
 0x617   : > { %vm1752_vm9 = vmor %vm1750_vm8, %vm1751_vm7 }
 0x618   : > { %v1746_v17 = vmul.f32 %v3153_v14, %v1745_v16  ;;  %v1743_v18 = vsel %vm1742_vm6, %v3151_v2, %v1739_v15 }
 0x619   : > { %v1754_v21 = vmul.f32 %v1743_v18, %v4372_v4 }
 0x61a   : > { %v1747_v19 = vmul.f32 0.5, %v1746_v17 }
 0x61b   : > { %v1759_v26 = vmul.f32 %v3135_v22, %v1754_v21 }
 0x61c   : > { %v1748_v20 = vsub.f32 1.5, %v1747_v19 }
 0x61d   : > { %v1764_v4 = vadd.f32 %v3136_v27, %v1759_v26 }
 0x61e   : > { %v1749_v23 = vmul.f32 %v3153_v14, %v1748_v20 }
 0x620   : > { %v1753_v24 = vsel %vm1752_vm9, %v3153_v14, %v1749_v23 }
 0x621   : > { %v1755_v25 = vmul.f32 %v1753_v24, %v4377_v7  ;;  %v2922_v7 = vld [vmem:[%s4215_s6 + $0x50] sm:$0xff] }
 0x622   : > { %2054 = vmatpush.bf16.msra.mxu1 %v2922_v7 }
 0x623   : > { %v1760_v28 = vmul.f32 %v3135_v22, %v1755_v25 }
 0x625   : > { %v1765_v29 = vadd.f32 %v3136_v27, %v1760_v28  ;;  %v3138_v28 = vld [vmem:[%s1045_s4] ss:$0 sm:$0xff]  ;;  %s4592_s4 = sld [smem:[#allocation62_spill]] (!%p2856_p3) }
 0x626   : > { %2055 = vmatpush.bf16.msra.mxu1 %v2921_v34 }
 0x627   : > { %v1766_v30 = vpack.c.bf16 %v1765_v29, %v1764_v4 }
 0x629   : > { %1877 = vmatmul.bf16.vlgmr.msrb.gmra.mxu3 %v1766_v30  ;;  %1891 = vmatmul.bf16.vlgmr.msrb.gmra.mxu0 %v1766_v30  ;;  %v3139_v30 = vld [vmem:[%s1054_s27] ss:$0 sm:$0xff] }
 0x62a   : > { %2056 = vmatpush.bf16.msra.mxu1 %v2920_v36 }
 0x6a6   : > { %v1892_v40 = vpop.f32.mrf.mxu0 }
 0x6a7   : > { %v1893_v43 = vadd.f32 %v1892_v40, %v1786_v41 }
 0x6a9   : > { %v1898_v47 = vmax.f32 %v1893_v43, 0.0 }
 0x6ac   : > { %v1878_v42 = vpop.f32.mrf.mxu3 }
 0x6ad   : > { %v1879_v49 = vadd.f32 %v1878_v42, %v1785_v45 }
 0x6ae   : > { %v1894_v44 = vpop.f32.mrf.mxu0 }
 0x6af   : > { %v1895_v46 = vadd.f32 %v1894_v44, %v1786_v41  ;;  %v1897_v53 = vmax.f32 %v1879_v49, 0.0 }
 0x6b1   : > { %v1900_v48 = vmax.f32 %v1895_v46, 0.0 }
 0x6b3   : > { %v1902_v50 = vpack.c.bf16 %v1900_v48, %v1898_v47 }
 0x6b4   : > { %v1880_v51 = vpop.f32.mrf.mxu3 }
 0x6b5   : > { %v1881_v52 = vadd.f32 %v1880_v51, %v1785_v45  ;;  %2057 = vmatmul.bf16.vlgmr.msra.gmra.mxu1 %v1902_v50 }
 0x6b7   : > { %v1899_v54 = vmax.f32 %v1881_v52, 0.0 }
 0x6b9   : > { %v1901_v55 = vpack.c.bf16 %v1899_v54, %v1897_v53 }
 0x6bb   : > { %2043 = vmatmul.bf16.vlgmr.msra.gmra.mxu2 %v1901_v55 }
 0x732   : > { %v2058_v57 = vpop.f32.mrf.mxu1 }
 0x73a   : > { %v2060_v1 = vpop.f32.mrf.mxu1 }
 0x73e   : > { %v2044_v58 = vpop.f32.mrf.mxu2 }
 0x73f   : > { %v2045_v59 = vadd.f32 %v3137_v56, %v2044_v58 }
 0x741   : > { %v2059_v60 = vadd.f32 %v2058_v57, %v2045_v59 }
 0x743   : > { %v2063_v61 = vadd.f32 %v2059_v60, %v1764_v4 }
 0x745   : > { %2067 = vadd.xlane.f32.xlu0 %v2063_v61 }
 0x746   : > { %v2046_v62 = vpop.f32.mrf.mxu2 }
 0x747   : > { %v2047_v63 = vadd.f32 %v3137_v56, %v2046_v62 }
 0x749   : > { %v2061_v3 = vadd.f32 %v2060_v1, %v2047_v63 }
 0x74b   : > { %v2064_v2 = vadd.f32 %v2061_v3, %v1765_v29 }
 0x74d   : > { %2069 = vadd.xlane.f32.xlu1 %v2064_v2 }
 0x7b8   : > { %v2068_v5 = vpop.xlane.xlu0 %2067 }
 0x7b9   : > { %v2071_v6 = vmul.f32 %v2068_v5, %v4369_v0 }
 0x7bb   : > { %v2073_v8 = vsub.f32 %v2063_v61, %v2071_v6 }
 0x7bd   : > { %v2075_v9 = vmul.f32 %v2073_v8, %v2073_v8 }
 0x7bf   : > { %2077 = vadd.xlane.f32.xlu2 %v2075_v9 }
 0x7c0   : > { %v2070_v10 = vpop.xlane.xlu1 %2069 }
 0x7c1   : > { %v2072_v11 = vmul.f32 %v2070_v10, %v4369_v0 }
 0x7c3   : > { %v2074_v12 = vsub.f32 %v2064_v2, %v2072_v11 }
 0x7c5   : > { %v2076_v13 = vmul.f32 %v2074_v12, %v2074_v12 }
 0x7c7   : > { %2079 = vadd.xlane.f32.xlu0 %v2076_v13 }
 0x832   : > { %v2078_v14 = vpop.xlane.xlu2 %2077 }
 0x833   : > { %v2081_v15 = vmul.f32 %v2078_v14, %v4369_v0 }
 0x835   : > { %v2083_v16 = vadd.f32 1e-05, %v2081_v15 }
 0x837   : > { %3154 = vrsqrt.f32 %v2083_v16  ;;  %vm2091_vm11 = vweird.f32 %v2083_v16 }
 0x83a   : > { %v2080_v17 = vpop.xlane.xlu0 %2079 }
 0x83b   : > { %v2082_v18 = vmul.f32 %v2080_v17, %v4369_v0 }
 0x83d   : > { %v3155_v19 = vpop.eup %3154  ;;  %v2084_v20 = vadd.f32 1e-05, %v2082_v18 }
 0x83e   : > { %v2086_v21 = vmul.f32 %v3155_v19, %v2083_v16  ;;  %vm2092_vm10 = vweird.f32 %v3155_v19 }
 0x83f   : > { %3156 = vrsqrt.f32 %v2084_v20  ;;  %vm2093_vm12 = vmor %vm2091_vm11, %vm2092_vm10  ;;  %vm2101_vm14 = vweird.f32 %v2084_v20 }
 0x840   : > { %v2087_v22 = vmul.f32 %v3155_v19, %v2086_v21 }
 0x842   : > { %v2088_v23 = vmul.f32 0.5, %v2087_v22 }
 0x844   : > { %v2089_v24 = vsub.f32 1.5, %v2088_v23 }
 0x845   : > { %v3157_v25 = vpop.eup %3156 }
 0x846   : > { %v2090_v26 = vmul.f32 %v3155_v19, %v2089_v24  ;;  %v2096_v27 = vmul.f32 %v3157_v25, %v2084_v20  ;;  %vm2102_vm13 = vweird.f32 %v3157_v25 }
 0x847   : > { %vm2103_vm15 = vmor %vm2101_vm14, %vm2102_vm13 }
 0x848   : > { %v2094_v4 = vsel %vm2093_vm12, %v3155_v19, %v2090_v26  ;;  %v2097_v29 = vmul.f32 %v3157_v25, %v2096_v27 }
 0x849   : > { %v2105_v31 = vmul.f32 %v2094_v4, %v2073_v8 }
 0x84a   : > { %v2098_v32 = vmul.f32 0.5, %v2097_v29 }
 0x84b   : > { %v2110_v7 = vmul.f32 %v3138_v28, %v2105_v31 }
 0x84c   : > { %v2099_v33 = vsub.f32 1.5, %v2098_v32 }
 0x84d   : > { %v2115_v34 = vadd.f32 %v3139_v30, %v2110_v7 }
 0x84e   : > { %v2100_v35 = vmul.f32 %v3157_v25, %v2099_v33 }
 0x84f   : > { %2117 = vst [vmem:[#allocation2] sm:$0xff] %v2115_v34 }
 0x850   : > { %v2104_v36 = vsel %vm2103_vm15, %v3157_v25, %v2100_v35 }
 0x851   : > { %v2106_v37 = vmul.f32 %v2104_v36, %v2074_v12 }
 0x853   : > { %v2111_v38 = vmul.f32 %v3138_v28, %v2106_v37  ;;  %2122 = sbr.rel (%p2856_p3) target bundleno = 2539 (0x9eb), region = 180 }
 0x855   : > { %v2116_v39 = vadd.f32 %v3139_v30, %v2111_v38 }
 0x857   : > { %2118 = vst [vmem:[#allocation2 + $0x8] sm:$0xff] %v2116_v39 }
 0x858   : > { %2125 = vadd.xlane.f32.xlu0 %v2115_v34  ;;  %v2190_v40 = vld [vmem:[#allocation29 + $0x78] sm:$0xff]  ;;  %v2189_v49 = vld [vmem:[#allocation29 + $0x70] sm:$0xff]  ;;  %v2188_v50 = vld [vmem:[#allocation29 + $0x68] sm:$0xff] }
 0x859   : > { %2195 = vmatpush.msra.mxu0 %v2190_v40  ;;  %2930 = vmatpush.msra.mxu1 %v2190_v40  ;;  %v2187_v51 = vld [vmem:[#allocation29 + $0x60] sm:$0xff]  ;;  %v2186_v52 = vld [vmem:[#allocation29 + $0x58] sm:$0xff]  ;;  %v2185_v53 = vld [vmem:[#allocation29 + $0x50] sm:$0xff] }
 0x85a   : > { %v2184_v54 = vld [vmem:[#allocation29 + $0x48] sm:$0xff]  ;;  %v2183_v55 = vld [vmem:[#allocation29 + $0x40] sm:$0xff]  ;;  %v2182_v56 = vld [vmem:[#allocation29 + $0x38] sm:$0xff] }
 0x85b   : > { %2196 = vmatpush.msra.mxu0 %v2189_v49  ;;  %2931 = vmatpush.msra.mxu1 %v2189_v49  ;;  %v2181_v57 = vld [vmem:[#allocation29 + $0x30] sm:$0xff]  ;;  %v2180_v58 = vld [vmem:[#allocation29 + $0x28] sm:$0xff]  ;;  %v2179_v59 = vld [vmem:[#allocation29 + $0x20] sm:$0xff] }
 0x85c   : > { %v2178_v60 = vld [vmem:[#allocation29 + $0x18] sm:$0xff]  ;;  %v2177_v61 = vld [vmem:[#allocation29 + $0x10] sm:$0xff]  ;;  %v2176_v62 = vld [vmem:[#allocation29 + $0x8] sm:$0xff] }
 0x85d   : > { %2197 = vmatpush.msra.mxu0 %v2188_v50  ;;  %2932 = vmatpush.msra.mxu1 %v2188_v50  ;;  %v2175_v63 = vld [vmem:[#allocation29] sm:$0xff]  ;;  %v3158_v17 = vld [vmem:[%s4590_s28] ss:$0 sm:$0xff] }
 0x85e   : > { %v3159_v20 = vld [vmem:[%s4591_s26] ss:$0 sm:$0xff] }
 0x85f   : > { %2198 = vmatpush.msra.mxu0 %v2187_v51  ;;  %2933 = vmatpush.msra.mxu1 %v2187_v51  ;;  %v3160_v29 = vld [vmem:[%s4592_s4] ss:$0 sm:$0xff] }
 0x860   : > { %2127 = vadd.xlane.f32.xlu0 %v2116_v39 }
 0x861   : > { %2199 = vmatpush.msra.mxu0 %v2186_v52  ;;  %2934 = vmatpush.msra.mxu1 %v2186_v52 }
 0x863   : > { %2200 = vmatpush.msra.mxu0 %v2185_v53  ;;  %2935 = vmatpush.msra.mxu1 %v2185_v53 }
 0x865   : > { %2201 = vmatpush.msra.mxu0 %v2184_v54  ;;  %2936 = vmatpush.msra.mxu1 %v2184_v54 }
 0x867   : > { %2202 = vmatpush.msra.mxu0 %v2183_v55  ;;  %2937 = vmatpush.msra.mxu1 %v2183_v55 }
 0x869   : > { %2203 = vmatpush.msra.mxu0 %v2182_v56  ;;  %2938 = vmatpush.msra.mxu1 %v2182_v56 }
 0x86b   : > { %2204 = vmatpush.msra.mxu0 %v2181_v57  ;;  %2939 = vmatpush.msra.mxu1 %v2181_v57 }
 0x86d   : > { %2205 = vmatpush.msra.mxu0 %v2180_v58  ;;  %2940 = vmatpush.msra.mxu1 %v2180_v58 }
 0x86f   : > { %2206 = vmatpush.msra.mxu0 %v2179_v59  ;;  %2941 = vmatpush.msra.mxu1 %v2179_v59 }
 0x871   : > { %2207 = vmatpush.msra.mxu0 %v2178_v60  ;;  %2942 = vmatpush.msra.mxu1 %v2178_v60 }
 0x873   : > { %2208 = vmatpush.msra.mxu0 %v2177_v61  ;;  %2943 = vmatpush.msra.mxu1 %v2177_v61 }
 0x875   : > { %2209 = vmatpush.msra.mxu0 %v2176_v62  ;;  %2944 = vmatpush.msra.mxu1 %v2176_v62 }
 0x877   : > { %2210 = vmatpush.msra.mxu0 %v2175_v63  ;;  %2945 = vmatpush.msra.mxu1 %v2175_v63 }
 0x8cb   : > { %v2126_v41 = vpop.xlane.xlu0 %2125 }
 0x8cc   : > { %v2129_v42 = vmul.f32 %v2126_v41, %v4369_v0 }
 0x8ce   : > { %v4453_v43 = vsub.f32 %v2115_v34, %v2129_v42 }
 0x8d0   : > { %v2133_v44 = vmul.f32 %v4453_v43, %v4453_v43 }
 0x8d2   : > { %2135 = vadd.xlane.f32.xlu1 %v2133_v44 }
 0x8d3   : > { %v2128_v45 = vpop.xlane.xlu0 %2127 }
 0x8d4   : > { %v2130_v46 = vmul.f32 %v2128_v45, %v4369_v0 }
 0x8d6   : > { %v4458_v47 = vsub.f32 %v2116_v39, %v2130_v46 }
 0x8d8   : > { %v2134_v48 = vmul.f32 %v4458_v47, %v4458_v47 }
 0x8da   : > { %2137 = vadd.xlane.f32.xlu1 %v2134_v48 }
 0x945   : > { %v2136_v1 = vpop.xlane.xlu1 %2135 }
 0x946   : > { %v2139_v3 = vmul.f32 %v2136_v1, %v4369_v0 }
 0x948   : > { %v2141_v2 = vadd.f32 1e-05, %v2139_v3 }
 0x94a   : > { %3161 = vrsqrt.f32 %v2141_v2  ;;  %vm2149_vm1 = vweird.f32 %v2141_v2 }
 0x94d   : > { %v2138_v5 = vpop.xlane.xlu1 %2137 }
 0x94e   : > { %v2140_v6 = vmul.f32 %v2138_v5, %v4369_v0 }
 0x950   : > { %v3162_v8 = vpop.eup %3161  ;;  %v2142_v9 = vadd.f32 1e-05, %v2140_v6 }
 0x951   : > { %v2144_v10 = vmul.f32 %v3162_v8, %v2141_v2  ;;  %vm2150_vm0 = vweird.f32 %v3162_v8 }
 0x952   : > { %3163 = vrsqrt.f32 %v2142_v9  ;;  %vm2151_vm2 = vmor %vm2149_vm1, %vm2150_vm0  ;;  %vm2159_vm4 = vweird.f32 %v2142_v9 }
 0x953   : > { %v2145_v11 = vmul.f32 %v3162_v8, %v2144_v10 }
 0x955   : > { %v2146_v12 = vmul.f32 0.5, %v2145_v11 }
 0x957   : > { %v2147_v13 = vsub.f32 1.5, %v2146_v12 }
 0x958   : > { %v3164_v14 = vpop.eup %3163 }
 0x959   : > { %v2148_v15 = vmul.f32 %v3162_v8, %v2147_v13  ;;  %v2154_v16 = vmul.f32 %v3164_v14, %v2142_v9  ;;  %vm2160_vm3 = vweird.f32 %v3164_v14 }
 0x95a   : > { %vm2161_vm5 = vmor %vm2159_vm4, %vm2160_vm3 }
 0x95b   : > { %v2155_v18 = vmul.f32 %v3164_v14, %v2154_v16  ;;  %v2152_v19 = vsel %vm2151_vm2, %v3162_v8, %v2148_v15 }
 0x95c   : > { %v2163_v0 = vmul.f32 %v2152_v19, %v4453_v43 }
 0x95d   : > { %v2156_v21 = vmul.f32 0.5, %v2155_v18 }
 0x95e   : > { %v2168_v22 = vmul.f32 %v3158_v17, %v2163_v0 }
 0x95f   : > { %v2157_v23 = vsub.f32 1.5, %v2156_v21 }
 0x960   : > { %v2173_v24 = vadd.f32 %v3159_v20, %v2168_v22 }
 0x961   : > { %v2158_v25 = vmul.f32 %v3164_v14, %v2157_v23 }
 0x962   : > { %2211 = vmatmul.f32.vlgmr.msra.gmra.mxu0 %v2173_v24 }
 0x963   : > { %v2162_v26 = vsel %vm2161_vm5, %v3164_v14, %v2158_v25 }
 0x964   : > { %v2164_v27 = vmul.f32 %v2162_v26, %v4458_v47 }
 0x966   : > { %v2169_v28 = vmul.f32 %v3158_v17, %v2164_v27 }
 0x968   : > { %v2174_v4 = vadd.f32 %v3159_v20, %v2169_v28 }
 0x96a   : > { %2214 = vmatmul.f32.vlgmr.msra.gmra.mxu1 %v2174_v4 }
 0x9df   : > { %v2212_v30 = vpop.f32.mrf.mxu0 }
 0x9e0   : > { %v2213_v31 = vadd.f32 %v3160_v29, %v2212_v30 }
 0x9e2   : > { %2218 = vst [vmem:[#allocation30] sm:$0xff] %v2213_v31 }
 0x9e7   : > { %v2215_v32 = vpop.f32.mrf.mxu1 }
 0x9e8   : > { %v2216_v7 = vadd.f32 %v3160_v29, %v2215_v32 }
 0x9ea   : > { %2219 = vst [vmem:[#allocation30 + $0x8] sm:$0xff] %v2216_v7 }
 0x9eb PF: > { %s4593_s30 = sld [smem:[#allocation46_spill]]  ;;  %s3808_s2 = smov [#allocation30]  }
 0x9ec   : > { %s4594_s5 = sld [smem:[#allocation63_spill]]  ;;  %s2228_s25 = sshll.u32 %s3808_s2, 4  ;;  %s2229_s25 = int_to_ptr.vmem [resolvable:$true] %s2228_s25 }
 0x9ed   : > { %s3809_s1 = smov 128   ;;  %s3810_s29 = smov 8  }
 0x9f1   : > { %p3068_p4 = scmp.eq.s32.totalorder %s4593_s30, 7 }
 0x9f2   : > { %s2230_s22 = sshll.u32 %s4594_s5, 4  ;;  %s2231_s22 = int_to_ptr.hbm [resolvable:$true] %s2230_s22 }
 0x9f3   : > { %2999 = dma.vmem_to_hbm [thread:$0]  (%p3068_p4), %s2229_s25, 256, %s2231_s22, [#allocation5], %s3809_s1, %s3809_s1, %s3810_s29  }
 0x9f4   : > { %3768 = dma.done.wait (%p3068_p4), [#allocation5], 256  }
 0x9f5   : > { %3770 = vsyncadd (%p3068_p4), [#allocation5], 4294967040 }
 0x9f6 PF: > { %s4595_s21 = sld [smem:[#allocation45_spill]]  ;;  %s4600_s27 = smov %s3789_s3 }
 0x9f7   : > { %s4596_s2 = sld [smem:[#allocation42_spill]] }
 0x9f8   : > { %s4597_s25 = sld [smem:[#allocation43_spill]] }
 0x9f9   : > { %s4598_s26 = sld [smem:[#allocation49_spill]] }
 0x9fa   : > { %s4599_s24 = sld [smem:[#allocation47_spill]] }
 0x9fc   : > { %s53_s28 = sadd.s32 1, %s4595_s21  }
 0x9fd   : > { %p50_p5 = scmp.ge.s32.totalorder %s53_s28, 10  }
 0x9ff   :  { %52 = sbr.rel (!%p50_p5) target bundleno = 32 (0x20), region = 299 }
 0xa00   : > { %s4601_s3 = smov %s4599_s24 }
 0xa04   :  { %2247 = vsyncpa [#allocation4], 1 }
 0xa05   :  { %2249 = vsyncpa [#allocation4 + $0x1], 1 }
 0xa06   :  { %2250 = vsyncpa [#allocation7], 1 }
 0xa07   :  { %2251 = vsyncpa [#allocation10], 1 }
 0xa08   :  { %2252 = vsyncpa [#allocation13], 1 }
 0xa09   :  { %2254 = vsyncpa [#allocation13 + $0x1], 1 }
 0xa0a   :  { %2255 = vsyncpa [#allocation16], 1 }
 0xa0b   :  { %2257 = vsyncpa [#allocation16 + $0x1], 1 }
 0xa0c   :  { %2258 = vsyncpa [#allocation19], 1 }
 0xa0d   :  { %2260 = vsyncpa [#allocation19 + $0x1], 1 }
 0xa0e   :  { %2261 = vsyncpa [#allocation22], 1 }
 0xa0f   :  { %2263 = vsyncpa [#allocation22 + $0x1], 1 }
 0xa10   :  { %2264 = vsyncpa [#allocation25], 1 }
 0xa11   :  { %2266 = vsyncpa [#allocation25 + $0x1], 1 }
 0xa12   :  { %2267 = vsyncpa [#allocation28], 1 }
 0xa13   :  { %2269 = vsyncpa [#allocation28 + $0x1], 1 }
 0xa14   :  { %2270 = vsyncpa [#allocation5], 1 }
 0xa15   :  { %2272 = vsyncpa [#allocation5 + $0x1], 1 }

</bundles_post_ra>
